<compile_context>
chip_gen: v6e
topology: v6e:2x2x1
jax: 0.10.0
libtpu: 0.0.40
codegen_flags: <defaults>
</compile_context>

<pallas_src>
import functools

import jax
import jax.numpy as jnp
from jax.experimental import pallas as pl
from jax.experimental.pallas import tpu as pltpu

LN_EPS = 1e-5  # torch.nn.LayerNorm default


# ---------------------------------------------------------------------------
# Fused kernel: 3x proj head -> exp -> resize-to-finest -> mean -> final resize
# ---------------------------------------------------------------------------
def cnn_depth_fused_kernel(d1_ref, d2_ref, d3_ref, w1s_ref, vecs_ref,
                           r1_ref, s1_ref, r2_ref, s2_ref, r3_ref, s3_ref,
                           afh_ref, afwt_ref,
                           final_ref, o1_ref, o2_ref, o3_ref,
                           acc_ref, *, mm_dtype, rdt):
    t = pl.program_id(1)
    last_t = pl.num_programs(1) - 1

    def head(x_cn, idx):
        """LN(C) -> Linear(C,C) -> LN(C) -> Linear(C,1), column-oriented, folded.

        x_cn: (C, N) f32, channels on sublanes, pixels on lanes.
        Host-folded params: W1f = W1^T diag(g1) (mm_dtype); packed f32 columns
        [b1f, gw2c, c2] with b1f = W1^T be1 + b1, gw2c = g2*w2 - mean(g2*w2),
        c2 = sum(be2*w2) + b2.  Returns z: (1, N) f32 pre-exp projection.
        """
        w1 = w1s_ref[idx]                               # (C, C) mm_dtype
        vec = vecs_ref[idx]                             # (C, 4) f32
        b1 = vec[:, 0:1]
        gw2c = vec[:, 1:2]
        c2 = vec[0:1, 2:3]

        # LayerNorm 1 (affine folded into W1 / b1); f32 math.
        mu = jnp.mean(x_cn, axis=0, keepdims=True)
        xc = x_cn - mu
        var = jnp.mean(xc * xc, axis=0, keepdims=True)
        xhat = xc * jax.lax.rsqrt(var + LN_EPS)

        # Linear(C, C) on the MXU.
        h = jnp.dot(w1, xhat.astype(mm_dtype),
                    preferred_element_type=jnp.float32) + b1

        # LayerNorm 2 + Linear(C,1) collapsed to three sublane reductions.
        mu2 = jnp.mean(h, axis=0, keepdims=True)
        var2 = jnp.maximum(jnp.mean(h * h, axis=0, keepdims=True) - mu2 * mu2, 0.0)
        s = jnp.sum(h * gw2c, axis=0, keepdims=True)
        return s * jax.lax.rsqrt(var2 + LN_EPS) + c2    # (1, N) f32

    def resize_contrib(z, r, s):
        """exp + bilinear resize-to-finest fused as (R * exp(z)) @ S -> (Ht, Wt) f32."""
        e = jnp.exp(z).astype(rdt)
        return jnp.dot(r * e, s, preferred_element_type=jnp.float32)

    # Coarse scales: processed whole, once per batch element (resident blocks).
    @pl.when(t == 0)
    def _init():
        z1 = head(d1_ref[...], 0)
        o1_ref[...] = z1
        z2 = head(d2_ref[...], 1)
        o2_ref[...] = z2
        acc_ref[...] = (resize_contrib(z1, r1_ref[...], s1_ref[...])
                        + resize_contrib(z2, r2_ref[...], s2_ref[...]))

    # Finest scale: one pixel tile per grid step, accumulated into acc.
    z3 = head(d3_ref[...], 2)
    o3_ref[...] = z3
    acc_ref[...] += resize_contrib(z3, r3_ref[...], s3_ref[...])

    # Last tile: mean over the 3 scales + final bilinear resize to image size.
    @pl.when(t == last_t)
    def _final():
        mid = (acc_ref[...] * (1.0 / 3.0)).astype(rdt)                  # (Ht, Wt)
        rows = jnp.dot(afh_ref[...], mid, preferred_element_type=jnp.float32)
        final_ref[...] = jnp.dot(rows.astype(rdt), afwt_ref[...],
                                 preferred_element_type=jnp.float32)


# ---------------------------------------------------------------------------
# Host-side helpers
# ---------------------------------------------------------------------------
def bilinear_matrix(out_size, in_size):
    """Row-stochastic 1-D bilinear resize matrix, align_corners=True."""
    i = jnp.arange(out_size, dtype=jnp.float32)
    if out_size == 1:
        src = jnp.zeros((1,), jnp.float32)
    else:
        src = i * (in_size - 1) / (out_size - 1)
    i0 = jnp.clip(jnp.floor(src).astype(jnp.int32), 0, in_size - 1)
    i1 = jnp.clip(i0 + 1, 0, in_size - 1)
    w1 = src - i0.astype(jnp.float32)
    w0 = 1.0 - w1
    rows = jnp.arange(out_size)
    A = jnp.zeros((out_size, in_size), jnp.float32)
    A = A.at[rows, i0].add(w0)
    A = A.at[rows, i1].add(w1)
    return A


def unflatten_resize_operators(h, w, Ht, Wt, dtype):
    """R (Ht, h*w), S (h*w, Wt) such that A_h @ unflat(z) @ A_w^T == (R * z) @ S."""
    Ah = bilinear_matrix(Ht, h)                 # (Ht, h)
    Aw = bilinear_matrix(Wt, w)                 # (Wt, w)
    n = jnp.arange(h * w)
    R = Ah[:, n // w]                           # R[t, r*w + c] = Ah[t, r]
    S = Aw.T[n % w, :]                          # S[r*w + c, t] = Aw[t, c]
    return R.astype(dtype), S.astype(dtype)


def pack_proj_params(proj_params, mm_dtype):
    """Fold LN affines into the Linears; pack per-head params densely."""
    w1s, vecs = [], []
    for p in proj_params:
        W1t = p["w1"].T                                   # (C_out, C_in)
        b1f = W1t @ p["be1"] + p["b1"]                    # LN1 shift folded
        W1f = W1t * p["g1"][None, :]                      # LN1 scale folded
        gw2 = p["g2"] * p["w2"][:, 0]
        gw2c = gw2 - jnp.mean(gw2)                        # absorbs -mu2 * sum(gw2)
        c2 = jnp.sum(p["be2"] * p["w2"][:, 0]) + p["b2"]
        C = W1f.shape[0]
        vec = jnp.stack([b1f, gw2c,
                         jnp.full((C,), c2, jnp.float32),
                         jnp.zeros((C,), jnp.float32)], axis=1)   # (C, 4)
        w1s.append(W1f.astype(mm_dtype))
        vecs.append(vec.astype(jnp.float32))
    return jnp.stack(w1s), jnp.stack(vecs)


def _choose_pixel_tile(n3, c, budget_bytes=2 << 20):
    """Largest multiple-of-128 divisor of n3 whose double-buffered (C, tile)
    f32 activation block fits the budget; falls back to no tiling."""
    if n3 % 128 != 0:
        return n3
    divisors = [d for d in range(128, n3 + 1, 128) if n3 % d == 0]
    if not divisors:
        return n3
    fitting = [d for d in divisors if 2 * 4 * c * d <= budget_bytes]
    return max(fitting) if fitting else min(divisors)


# ---------------------------------------------------------------------------
# CNNDepth.forward (gt=None path)
# ---------------------------------------------------------------------------
def cnn_depth_forward(image, decoder_outputs, proj_params,
                      matmul_in_bf16=None, resize_in_bf16=True,
                      pixel_tile=None):
    assert len(decoder_outputs) == 3 and len(proj_params) == 3
    Ho, Wo = image.shape[-2:]
    B, C = decoder_outputs[0].shape[:2]
    (h1, w1), (h2, w2), (h3, w3) = [d.shape[-2:] for d in decoder_outputs]
    N1, N2, N3 = h1 * w1, h2 * w2, h3 * w3
    Ht, Wt = h3, w3

    if matmul_in_bf16 is None:
        matmul_in_bf16 = C >= 128
    mm_dtype = jnp.bfloat16 if matmul_in_bf16 else jnp.float32
    rdt = jnp.bfloat16 if resize_in_bf16 else jnp.float32

    tile = _choose_pixel_tile(N3, C) if pixel_tile is None else int(pixel_tile)
    if N3 % tile != 0:
        raise ValueError(f"pixel_tile {tile} must divide h3*w3={N3}")
    if tile != N3 and tile % 128 != 0:
        raise ValueError("pixel_tile must be a multiple of 128 (or == h3*w3)")
    T = N3 // tile

    # Free contiguous reshapes only -- no host transposes / extra HBM passes.
    d1 = decoder_outputs[0].reshape(B, C, N1)
    d2 = decoder_outputs[1].reshape(B, C, N2)
    d3 = decoder_outputs[2].reshape(B, C, N3)

    w1s, vecs = pack_proj_params(proj_params, mm_dtype)
    R1, S1 = unflatten_resize_operators(h1, w1, Ht, Wt, rdt)
    R2, S2 = unflatten_resize_operators(h2, w2, Ht, Wt, rdt)
    R3, S3 = unflatten_resize_operators(h3, w3, Ht, Wt, rdt)   # identity resize
    Afh = bilinear_matrix(Ho, Ht).astype(rdt)
    AfwT = bilinear_matrix(Wo, Wt).T.astype(rdt)

    args = (d1, d2, d3, w1s, vecs, R1, S1, R2, S2, R3, S3, Afh, AfwT)

    def const_spec(a):
        return pl.BlockSpec(a.shape, lambda b, t: (0,) * a.ndim)

    in_specs = [
        pl.BlockSpec((None, C, N1), lambda b, t: (b, 0, 0)),
        pl.BlockSpec((None, C, N2), lambda b, t: (b, 0, 0)),
        pl.BlockSpec((None, C, tile), lambda b, t: (b, 0, t)),
        const_spec(w1s), const_spec(vecs),
        const_spec(R1), const_spec(S1), const_spec(R2), const_spec(S2),
        pl.BlockSpec((Ht, tile), lambda b, t: (0, t)),
        pl.BlockSpec((tile, Wt), lambda b, t: (t, 0)),
        const_spec(Afh), const_spec(AfwT),
    ]

    out_shape = (
        jax.ShapeDtypeStruct((B, Ho, Wo), jnp.float32),
        jax.ShapeDtypeStruct((B, 1, N1), jnp.float32),
        jax.ShapeDtypeStruct((B, 1, N2), jnp.float32),
        jax.ShapeDtypeStruct((B, 1, N3), jnp.float32),
    )
    out_specs = (
        pl.BlockSpec((None, Ho, Wo), lambda b, t: (b, 0, 0)),
        pl.BlockSpec((None, 1, N1), lambda b, t: (b, 0, 0)),
        pl.BlockSpec((None, 1, N2), lambda b, t: (b, 0, 0)),
        pl.BlockSpec((None, 1, tile), lambda b, t: (b, 0, t)),
    )

    # VMEM budget: resident constants + double-buffered per-step blocks + acc.
    ritem = jnp.dtype(rdt).itemsize
    const_bytes = sum(int(a.size) * a.dtype.itemsize
                      for a in (w1s, vecs, R1, S1, R2, S2, Afh, AfwT))
    step_bytes = (2 * 4 * C * (N1 + N2 + tile)            # activations (f32)
                  + 2 * ritem * tile * (Ht + Wt)          # R3 / S3 tiles
                  + 2 * 4 * (Ho * Wo + N1 + N2 + tile)    # outputs (f32)
                  + 4 * Ht * Wt)                          # accumulator scratch
    vmem_limit = int(min(max(2 * (const_bytes + step_bytes), 32 << 20), 64 << 20))

    kernel = functools.partial(cnn_depth_fused_kernel, mm_dtype=mm_dtype, rdt=rdt)

    final, o1, o2, o3 = pl.pallas_call(
        kernel,
        out_shape=out_shape,
        grid=(B, T),
        in_specs=in_specs,
        out_specs=out_specs,
        scratch_shapes=[pltpu.VMEM((Ht, Wt), jnp.float32)],
        compiler_params=pltpu.CompilerParams(
            dimension_semantics=("parallel", "arbitrary"),
            vmem_limit_bytes=vmem_limit),
    )(*args)

    outs = [o1.reshape(B, 1, h1, w1),
            o2.reshape(B, 1, h2, w2),
            o3.reshape(B, 1, h3, w3)]
    losses = {"opt": {}, "stat": {}}                       # gt is None -> no loss
    return final[:, None], losses, {"outs": outs}


# ---------------------------------------------------------------------------
# Pure-JAX reference (for validation only)
# ---------------------------------------------------------------------------
def cnn_depth_forward_ref(image, decoder_outputs, proj_params):
    Ho, Wo = image.shape[-2:]
    Ht, Wt = decoder_outputs[-1].shape[-2:]
    outs = []
    for d, p in zip(decoder_outputs, proj_params):
        b, c, h, w = d.shape
        x = jnp.transpose(d, (0, 2, 3, 1)).reshape(b, h * w, c)
        mu = x.mean(-1, keepdims=True); xc = x - mu
        xn = xc * jax.lax.rsqrt((xc * xc).mean(-1, keepdims=True) + LN_EPS)
        xn = xn * p["g1"] + p["be1"]
        hd = xn @ p["w1"] + p["b1"]
        mu2 = hd.mean(-1, keepdims=True); hc = hd - mu2
        hn = hc * jax.lax.rsqrt((hc * hc).mean(-1, keepdims=True) + LN_EPS)
        hn = hn * p["g2"] + p["be2"]
        z = hn @ p["w2"] + p["b2"]
        outs.append(jnp.transpose(z.reshape(b, h, w, 1), (0, 3, 1, 2)))
    mids = []
    for o in outs:
        h, w = o.shape[-2:]
        ah = bilinear_matrix(Ht, h); aw = bilinear_matrix(Wt, w)
        mids.append(jnp.einsum("ri,bij,sj->brs", ah, jnp.exp(o[:, 0]), aw))
    mid = (mids[0] + mids[1] + mids[2]) / 3.0
    afh = bilinear_matrix(Ho, Ht); afw = bilinear_matrix(Wo, Wt)
    final = jnp.einsum("ri,bij,sj->brs", afh, mid, afw)
    return final[:, None], outs


def init_proj_params(key, C):
    params = []
    for _ in range(3):
        key, k1, k2, k3, k4, k5, k6, k7, k8 = jax.random.split(key, 9)
        params.append({
            "g1": 1.0 + 0.1 * jax.random.normal(k5, (C,), jnp.float32),
            "be1": 0.1 * jax.random.normal(k6, (C,), jnp.float32),
            "w1": jax.random.normal(k1, (C, C), jnp.float32) / jnp.sqrt(C),
            "b1": 0.01 * jax.random.normal(k2, (C,), jnp.float32),
            "g2": 1.0 + 0.1 * jax.random.normal(k7, (C,), jnp.float32),
            "be2": 0.1 * jax.random.normal(k8, (C,), jnp.float32),
            "w2": jax.random.normal(k3, (C, 1), jnp.float32) / jnp.sqrt(C),
            "b2": 0.01 * jax.random.normal(k4, (), jnp.float32),
        })
    return params


if __name__ == "__main__":
    key = jax.random.PRNGKey(0)
    B, C = 2, 32                      # decoder_dim = 32 (small synthetic config)
    k_img, k_d1, k_d2, k_d3, k_p = jax.random.split(key, 5)

    image = jax.random.normal(k_img, (B, 3, 32, 32), jnp.float32)

    # TODO(synk): stand-ins for the (filtered, order-inverted) pixel_decoder outputs.
    decoder_outputs = [
        0.1 * jax.random.normal(k_d1, (B, C, 4, 4), jnp.float32),
        0.1 * jax.random.normal(k_d2, (B, C, 8, 8), jnp.float32),
        0.1 * jax.random.normal(k_d3, (B, C, 16, 16), jnp.float32),
    ]
    proj_params = init_proj_params(k_p, C)

    ref_final, ref_outs = cnn_depth_forward_ref(image, decoder_outputs, proj_params)
    ref_max = float(jnp.max(jnp.abs(ref_final)))

    def check(out, aux):
        assert out.shape == (B, 1, 32, 32), out.shape
        assert len(aux["outs"]) == 3 and aux["outs"][0].shape == (B, 1, 4, 4)
        assert bool(jnp.all(jnp.isfinite(out)))
        err = float(jnp.max(jnp.abs(out - ref_final)))
        assert err <= 5e-2 + 5e-2 * ref_max, f"final mismatch: {err} (ref max {ref_max})"
        for o, ro in zip(aux["outs"], ref_outs):
            e = float(jnp.max(jnp.abs(o - ro)))
            assert e <= 5e-2 + 5e-2 * float(jnp.max(jnp.abs(ro))), f"proj mismatch: {e}"

    # Auto pixel tile (single pipeline step per batch element).
    out_a, _, aux_a = cnn_depth_forward(image, decoder_outputs, proj_params)
    out_a = jax.block_until_ready(out_a)
    check(out_a, aux_a)

    # Tiled pixel axis (T=2): exercises the accumulate-over-tiles pipeline.
    out_b, _, aux_b = cnn_depth_forward(image, decoder_outputs, proj_params,
                                        pixel_tile=128)
    out_b = jax.block_until_ready(out_b)
    check(out_b, aux_b)

    print("KERNEL_OK")
</pallas_src>

<mosaic_0001>
module attributes {stable_mosaic.version = 11 : i64} {
  func.func @cnn_depth_fused_kernel(%arg0: i32, %arg1: i32, %arg2: memref<1x32x16xf32, #tpu.memory_space<vmem>>, %arg3: memref<1x32x64xf32, #tpu.memory_space<vmem>>, %arg4: memref<1x32x256xf32, #tpu.memory_space<vmem>>, %arg5: memref<3x32x32xf32, #tpu.memory_space<vmem>>, %arg6: memref<3x32x4xf32, #tpu.memory_space<vmem>>, %arg7: memref<16x16xbf16, #tpu.memory_space<vmem>>, %arg8: memref<16x16xbf16, #tpu.memory_space<vmem>>, %arg9: memref<16x64xbf16, #tpu.memory_space<vmem>>, %arg10: memref<64x16xbf16, #tpu.memory_space<vmem>>, %arg11: memref<16x256xbf16, #tpu.memory_space<vmem>>, %arg12: memref<256x16xbf16, #tpu.memory_space<vmem>>, %arg13: memref<32x16xbf16, #tpu.memory_space<vmem>>, %arg14: memref<16x32xbf16, #tpu.memory_space<vmem>>, %arg15: memref<1x32x32xf32, #tpu.memory_space<vmem>>, %arg16: memref<1x1x16xf32, #tpu.memory_space<vmem>>, %arg17: memref<1x1x64xf32, #tpu.memory_space<vmem>>, %arg18: memref<1x1x256xf32, #tpu.memory_space<vmem>>, %arg19: memref<16x16xf32, #tpu.memory_space<vmem>>) attributes {dimension_semantics = [#tpu.dimension_semantics<parallel>, #tpu.dimension_semantics<arbitrary>], iteration_bounds = array<i64: 2, 1>, scalar_prefetch = 0 : i64, scratch_operands = 1 : i64, tpu.core_type = #tpu.core_type<tc>, window_params = [{transform_indices = @transform_0, window_bounds = array<i64: 1, 32, 16>}, {transform_indices = @transform_1, window_bounds = array<i64: 1, 32, 64>}, {transform_indices = @transform_2, window_bounds = array<i64: 1, 32, 256>}, {pipeline_mode = #tpu.pipeline_mode<synchronous>, transform_indices = @transform_3, window_bounds = array<i64: 3, 32, 32>}, {pipeline_mode = #tpu.pipeline_mode<synchronous>, transform_indices = @transform_4, window_bounds = array<i64: 3, 32, 4>}, {pipeline_mode = #tpu.pipeline_mode<synchronous>, transform_indices = @transform_5, window_bounds = array<i64: 16, 16>}, {pipeline_mode = #tpu.pipeline_mode<synchronous>, transform_indices = @transform_6, window_bounds = array<i64: 16, 16>}, {pipeline_mode = #tpu.pipeline_mode<synchronous>, transform_indices = @transform_7, window_bounds = array<i64: 16, 64>}, {pipeline_mode = #tpu.pipeline_mode<synchronous>, transform_indices = @transform_8, window_bounds = array<i64: 64, 16>}, {transform_indices = @transform_9, window_bounds = array<i64: 16, 256>}, {transform_indices = @transform_10, window_bounds = array<i64: 256, 16>}, {pipeline_mode = #tpu.pipeline_mode<synchronous>, transform_indices = @transform_11, window_bounds = array<i64: 32, 16>}, {pipeline_mode = #tpu.pipeline_mode<synchronous>, transform_indices = @transform_12, window_bounds = array<i64: 16, 32>}, {transform_indices = @transform_13, window_bounds = array<i64: 1, 32, 32>}, {transform_indices = @transform_14, window_bounds = array<i64: 1, 1, 16>}, {transform_indices = @transform_15, window_bounds = array<i64: 1, 1, 64>}, {transform_indices = @transform_16, window_bounds = array<i64: 1, 1, 256>}]} {
    %c0_i32 = arith.constant 0 : i32
    %0 = arith.cmpi eq, %arg1, %c0_i32 : i32
    %1 = arith.extui %0 : i1 to i32
    %c0_i32_0 = arith.constant 0 : i32
    %2 = arith.cmpi ne, %1, %c0_i32_0 : i32
    scf.if %2 {
      %c0_34 = arith.constant 0 : index
      %c0_35 = arith.constant 0 : index
      %c0_36 = arith.constant 0 : index
      %70 = vector.load %arg2[%c0_34, %c0_35, %c0_36] : memref<1x32x16xf32, #tpu.memory_space<vmem>>, vector<1x32x16xf32>
      %71 = vector.shape_cast %70 : vector<1x32x16xf32> to vector<32x16xf32>
      %c0_37 = arith.constant 0 : index
      %c0_38 = arith.constant 0 : index
      %c0_39 = arith.constant 0 : index
      %72 = vector.load %arg5[%c0_37, %c0_38, %c0_39] : memref<3x32x32xf32, #tpu.memory_space<vmem>>, vector<1x32x32xf32>
      %73 = vector.shape_cast %72 : vector<1x32x32xf32> to vector<32x32xf32>
      %c0_40 = arith.constant 0 : index
      %c0_41 = arith.constant 0 : index
      %c0_42 = arith.constant 0 : index
      %74 = vector.load %arg6[%c0_40, %c0_41, %c0_42] : memref<3x32x4xf32, #tpu.memory_space<vmem>>, vector<1x32x4xf32>
      %75 = vector.shape_cast %74 : vector<1x32x4xf32> to vector<32x4xf32>
      %76 = vector.extract_strided_slice %75 {offsets = [0, 0], sizes = [32, 1], strides = [1, 1]} : vector<32x4xf32> to vector<32x1xf32>
      %77 = vector.extract_strided_slice %75 {offsets = [0, 1], sizes = [32, 1], strides = [1, 1]} : vector<32x4xf32> to vector<32x1xf32>
      %78 = vector.extract_strided_slice %75 {offsets = [0, 2], sizes = [1, 1], strides = [1, 1]} : vector<32x4xf32> to vector<1x1xf32>
      %cst_43 = arith.constant dense<0.000000e+00> : vector<16xf32>
      %79 = vector.multi_reduction <add>, %71, %cst_43 [0] : vector<32x16xf32> to vector<16xf32>
      %80 = vector.shape_cast %79 : vector<16xf32> to vector<1x16xf32>
      %cst_44 = arith.constant 3.200000e+01 : f32
      %81 = vector.broadcast %cst_44 : f32 to vector<1x16xf32>
      %82 = arith.divf %80, %81 : vector<1x16xf32>
      %83 = vector.broadcast %82 : vector<1x16xf32> to vector<32x16xf32>
      %84 = arith.subf %71, %83 : vector<32x16xf32>
      %85 = arith.mulf %84, %84 : vector<32x16xf32>
      %cst_45 = arith.constant dense<0.000000e+00> : vector<16xf32>
      %86 = vector.multi_reduction <add>, %85, %cst_45 [0] : vector<32x16xf32> to vector<16xf32>
      %87 = vector.shape_cast %86 : vector<16xf32> to vector<1x16xf32>
      %cst_46 = arith.constant 3.200000e+01 : f32
      %88 = vector.broadcast %cst_46 : f32 to vector<1x16xf32>
      %89 = arith.divf %87, %88 : vector<1x16xf32>
      %cst_47 = arith.constant 9.99999974E-6 : f32
      %90 = vector.broadcast %cst_47 : f32 to vector<1x16xf32>
      %91 = arith.addf %89, %90 : vector<1x16xf32>
      %92 = math.rsqrt %91 : vector<1x16xf32>
      %93 = vector.broadcast %92 : vector<1x16xf32> to vector<32x16xf32>
      %94 = arith.mulf %84, %93 : vector<32x16xf32>
      %cst_48 = arith.constant dense<0.000000e+00> : vector<32x16xf32>
      %95 = tpu.matmul %73, %94, %cst_48 {dimension_numbers = #tpu.dot_dimension_numbers<[1], [0], [0], [1], [0, 0, 1, 1], [], []>} : vector<32x32xf32>, vector<32x16xf32>, vector<32x16xf32> -> vector<32x16xf32>
      %96 = vector.broadcast %76 : vector<32x1xf32> to vector<32x16xf32>
      %97 = arith.addf %95, %96 : vector<32x16xf32>
      %cst_49 = arith.constant dense<0.000000e+00> : vector<16xf32>
      %98 = vector.multi_reduction <add>, %97, %cst_49 [0] : vector<32x16xf32> to vector<16xf32>
      %99 = vector.shape_cast %98 : vector<16xf32> to vector<1x16xf32>
      %cst_50 = arith.constant 3.200000e+01 : f32
      %100 = vector.broadcast %cst_50 : f32 to vector<1x16xf32>
      %101 = arith.divf %99, %100 : vector<1x16xf32>
      %102 = arith.mulf %97, %97 : vector<32x16xf32>
      %cst_51 = arith.constant dense<0.000000e+00> : vector<16xf32>
      %103 = vector.multi_reduction <add>, %102, %cst_51 [0] : vector<32x16xf32> to vector<16xf32>
      %104 = vector.shape_cast %103 : vector<16xf32> to vector<1x16xf32>
      %cst_52 = arith.constant 3.200000e+01 : f32
      %105 = vector.broadcast %cst_52 : f32 to vector<1x16xf32>
      %106 = arith.divf %104, %105 : vector<1x16xf32>
      %107 = arith.mulf %101, %101 : vector<1x16xf32>
      %108 = arith.subf %106, %107 : vector<1x16xf32>
      %cst_53 = arith.constant 0.000000e+00 : f32
      %109 = vector.broadcast %cst_53 : f32 to vector<1x16xf32>
      %110 = arith.maximumf %108, %109 : vector<1x16xf32>
      %111 = vector.broadcast %77 : vector<32x1xf32> to vector<32x16xf32>
      %112 = arith.mulf %97, %111 : vector<32x16xf32>
      %cst_54 = arith.constant dense<0.000000e+00> : vector<16xf32>
      %113 = vector.multi_reduction <add>, %112, %cst_54 [0] : vector<32x16xf32> to vector<16xf32>
      %114 = vector.shape_cast %113 : vector<16xf32> to vector<1x16xf32>
      %cst_55 = arith.constant 9.99999974E-6 : f32
      %115 = vector.broadcast %cst_55 : f32 to vector<1x16xf32>
      %116 = arith.addf %110, %115 : vector<1x16xf32>
      %117 = math.rsqrt %116 : vector<1x16xf32>
      %118 = arith.mulf %114, %117 : vector<1x16xf32>
      %119 = vector.broadcast %78 : vector<1x1xf32> to vector<1x16xf32>
      %120 = arith.addf %118, %119 : vector<1x16xf32>
      %c0_56 = arith.constant 0 : index
      %c0_57 = arith.constant 0 : index
      %c0_58 = arith.constant 0 : index
      %121 = vector.load %arg16[%c0_56, %c0_57, %c0_58] : memref<1x1x16xf32, #tpu.memory_space<vmem>>, vector<1x1x16xf32>
      %122 = vector.shape_cast %121 : vector<1x1x16xf32> to vector<1x16xf32>
      %123 = vector.shape_cast %120 : vector<1x16xf32> to vector<1x1x16xf32>
      tpu.vector_store %arg16[%c0_56, %c0_57, %c0_58], %123 {strides = array<i32>} : memref<1x1x16xf32, #tpu.memory_space<vmem>>, vector<1x1x16xf32>,
      %c0_59 = arith.constant 0 : index
      %c0_60 = arith.constant 0 : index
      %c0_61 = arith.constant 0 : index
      %124 = vector.load %arg3[%c0_59, %c0_60, %c0_61] : memref<1x32x64xf32, #tpu.memory_space<vmem>>, vector<1x32x64xf32>
      %125 = vector.shape_cast %124 : vector<1x32x64xf32> to vector<32x64xf32>
      %c1 = arith.constant 1 : index
      %c0_62 = arith.constant 0 : index
      %c0_63 = arith.constant 0 : index
      %126 = vector.load %arg5[%c1, %c0_62, %c0_63] : memref<3x32x32xf32, #tpu.memory_space<vmem>>, vector<1x32x32xf32>
      %127 = vector.shape_cast %126 : vector<1x32x32xf32> to vector<32x32xf32>
      %c1_64 = arith.constant 1 : index
      %c0_65 = arith.constant 0 : index
      %c0_66 = arith.constant 0 : index
      %128 = vector.load %arg6[%c1_64, %c0_65, %c0_66] : memref<3x32x4xf32, #tpu.memory_space<vmem>>, vector<1x32x4xf32>
      %129 = vector.shape_cast %128 : vector<1x32x4xf32> to vector<32x4xf32>
      %130 = vector.extract_strided_slice %129 {offsets = [0, 0], sizes = [32, 1], strides = [1, 1]} : vector<32x4xf32> to vector<32x1xf32>
      %131 = vector.extract_strided_slice %129 {offsets = [0, 1], sizes = [32, 1], strides = [1, 1]} : vector<32x4xf32> to vector<32x1xf32>
      %132 = vector.extract_strided_slice %129 {offsets = [0, 2], sizes = [1, 1], strides = [1, 1]} : vector<32x4xf32> to vector<1x1xf32>
      %cst_67 = arith.constant dense<0.000000e+00> : vector<64xf32>
      %133 = vector.multi_reduction <add>, %125, %cst_67 [0] : vector<32x64xf32> to vector<64xf32>
      %134 = vector.shape_cast %133 : vector<64xf32> to vector<1x64xf32>
      %cst_68 = arith.constant 3.200000e+01 : f32
      %135 = vector.broadcast %cst_68 : f32 to vector<1x64xf32>
      %136 = arith.divf %134, %135 : vector<1x64xf32>
      %137 = vector.broadcast %136 : vector<1x64xf32> to vector<32x64xf32>
      %138 = arith.subf %125, %137 : vector<32x64xf32>
      %139 = arith.mulf %138, %138 : vector<32x64xf32>
      %cst_69 = arith.constant dense<0.000000e+00> : vector<64xf32>
      %140 = vector.multi_reduction <add>, %139, %cst_69 [0] : vector<32x64xf32> to vector<64xf32>
      %141 = vector.shape_cast %140 : vector<64xf32> to vector<1x64xf32>
      %cst_70 = arith.constant 3.200000e+01 : f32
      %142 = vector.broadcast %cst_70 : f32 to vector<1x64xf32>
      %143 = arith.divf %141, %142 : vector<1x64xf32>
      %cst_71 = arith.constant 9.99999974E-6 : f32
      %144 = vector.broadcast %cst_71 : f32 to vector<1x64xf32>
      %145 = arith.addf %143, %144 : vector<1x64xf32>
      %146 = math.rsqrt %145 : vector<1x64xf32>
      %147 = vector.broadcast %146 : vector<1x64xf32> to vector<32x64xf32>
      %148 = arith.mulf %138, %147 : vector<32x64xf32>
      %cst_72 = arith.constant dense<0.000000e+00> : vector<32x64xf32>
      %149 = tpu.matmul %127, %148, %cst_72 {dimension_numbers = #tpu.dot_dimension_numbers<[1], [0], [0], [1], [0, 0, 1, 1], [], []>} : vector<32x32xf32>, vector<32x64xf32>, vector<32x64xf32> -> vector<32x64xf32>
      %150 = vector.broadcast %130 : vector<32x1xf32> to vector<32x64xf32>
      %151 = arith.addf %149, %150 : vector<32x64xf32>
      %cst_73 = arith.constant dense<0.000000e+00> : vector<64xf32>
      %152 = vector.multi_reduction <add>, %151, %cst_73 [0] : vector<32x64xf32> to vector<64xf32>
      %153 = vector.shape_cast %152 : vector<64xf32> to vector<1x64xf32>
      %cst_74 = arith.constant 3.200000e+01 : f32
      %154 = vector.broadcast %cst_74 : f32 to vector<1x64xf32>
      %155 = arith.divf %153, %154 : vector<1x64xf32>
      %156 = arith.mulf %151, %151 : vector<32x64xf32>
      %cst_75 = arith.constant dense<0.000000e+00> : vector<64xf32>
      %157 = vector.multi_reduction <add>, %156, %cst_75 [0] : vector<32x64xf32> to vector<64xf32>
      %158 = vector.shape_cast %157 : vector<64xf32> to vector<1x64xf32>
      %cst_76 = arith.constant 3.200000e+01 : f32
      %159 = vector.broadcast %cst_76 : f32 to vector<1x64xf32>
      %160 = arith.divf %158, %159 : vector<1x64xf32>
      %161 = arith.mulf %155, %155 : vector<1x64xf32>
      %162 = arith.subf %160, %161 : vector<1x64xf32>
      %cst_77 = arith.constant 0.000000e+00 : f32
      %163 = vector.broadcast %cst_77 : f32 to vector<1x64xf32>
      %164 = arith.maximumf %162, %163 : vector<1x64xf32>
      %165 = vector.broadcast %131 : vector<32x1xf32> to vector<32x64xf32>
      %166 = arith.mulf %151, %165 : vector<32x64xf32>
      %cst_78 = arith.constant dense<0.000000e+00> : vector<64xf32>
      %167 = vector.multi_reduction <add>, %166, %cst_78 [0] : vector<32x64xf32> to vector<64xf32>
      %168 = vector.shape_cast %167 : vector<64xf32> to vector<1x64xf32>
      %cst_79 = arith.constant 9.99999974E-6 : f32
      %169 = vector.broadcast %cst_79 : f32 to vector<1x64xf32>
      %170 = arith.addf %164, %169 : vector<1x64xf32>
      %171 = math.rsqrt %170 : vector<1x64xf32>
      %172 = arith.mulf %168, %171 : vector<1x64xf32>
      %173 = vector.broadcast %132 : vector<1x1xf32> to vector<1x64xf32>
      %174 = arith.addf %172, %173 : vector<1x64xf32>
      %c0_80 = arith.constant 0 : index
      %c0_81 = arith.constant 0 : index
      %c0_82 = arith.constant 0 : index
      %175 = vector.load %arg17[%c0_80, %c0_81, %c0_82] : memref<1x1x64xf32, #tpu.memory_space<vmem>>, vector<1x1x64xf32>
      %176 = vector.shape_cast %175 : vector<1x1x64xf32> to vector<1x64xf32>
      %177 = vector.shape_cast %174 : vector<1x64xf32> to vector<1x1x64xf32>
      tpu.vector_store %arg17[%c0_80, %c0_81, %c0_82], %177 {strides = array<i32>} : memref<1x1x64xf32, #tpu.memory_space<vmem>>, vector<1x1x64xf32>,
      %c0_83 = arith.constant 0 : index
      %c0_84 = arith.constant 0 : index
      %178 = vector.load %arg7[%c0_83, %c0_84] : memref<16x16xbf16, #tpu.memory_space<vmem>>, vector<16x16xbf16>
      %c0_85 = arith.constant 0 : index
      %c0_86 = arith.constant 0 : index
      %179 = vector.load %arg8[%c0_85, %c0_86] : memref<16x16xbf16, #tpu.memory_space<vmem>>, vector<16x16xbf16>
      %180 = math.exp %120 : vector<1x16xf32>
      %181 = arith.truncf %180 : vector<1x16xf32> to vector<1x16xbf16>
      %182 = vector.broadcast %181 : vector<1x16xbf16> to vector<16x16xbf16>
      %183 = arith.mulf %178, %182 : vector<16x16xbf16>
      %cst_87 = arith.constant dense<0.000000e+00> : vector<16x16xf32>
      %184 = tpu.matmul %183, %179, %cst_87 {dimension_numbers = #tpu.dot_dimension_numbers<[1], [0], [0], [1], [0, 0, 1, 1], [], []>} : vector<16x16xbf16>, vector<16x16xbf16>, vector<16x16xf32> -> vector<16x16xf32>
      %c0_88 = arith.constant 0 : index
      %c0_89 = arith.constant 0 : index
      %185 = vector.load %arg9[%c0_88, %c0_89] : memref<16x64xbf16, #tpu.memory_space<vmem>>, vector<16x64xbf16>
      %c0_90 = arith.constant 0 : index
      %c0_91 = arith.constant 0 : index
      %186 = vector.load %arg10[%c0_90, %c0_91] : memref<64x16xbf16, #tpu.memory_space<vmem>>, vector<64x16xbf16>
      %187 = math.exp %174 : vector<1x64xf32>
      %188 = arith.truncf %187 : vector<1x64xf32> to vector<1x64xbf16>
      %189 = vector.broadcast %188 : vector<1x64xbf16> to vector<16x64xbf16>
      %190 = arith.mulf %185, %189 : vector<16x64xbf16>
      %cst_92 = arith.constant dense<0.000000e+00> : vector<16x16xf32>
      %191 = tpu.matmul %190, %186, %cst_92 {dimension_numbers = #tpu.dot_dimension_numbers<[1], [0], [0], [1], [0, 0, 1, 1], [], []>} : vector<16x64xbf16>, vector<64x16xbf16>, vector<16x16xf32> -> vector<16x16xf32>
      %192 = arith.addf %184, %191 : vector<16x16xf32>
      %c0_93 = arith.constant 0 : index
      %c0_94 = arith.constant 0 : index
      %193 = vector.load %arg19[%c0_93, %c0_94] : memref<16x16xf32, #tpu.memory_space<vmem>>, vector<16x16xf32>
      tpu.vector_store %arg19[%c0_93, %c0_94], %192 {strides = array<i32>} : memref<16x16xf32, #tpu.memory_space<vmem>>, vector<16x16xf32>,
    } else {
    }
    %c0 = arith.constant 0 : index
    %c0_1 = arith.constant 0 : index
    %c0_2 = arith.constant 0 : index
    %3 = vector.load %arg4[%c0, %c0_1, %c0_2] : memref<1x32x256xf32, #tpu.memory_space<vmem>>, vector<1x32x256xf32>
    %4 = vector.shape_cast %3 : vector<1x32x256xf32> to vector<32x256xf32>
    %c2 = arith.constant 2 : index
    %c0_3 = arith.constant 0 : index
    %c0_4 = arith.constant 0 : index
    %5 = vector.load %arg5[%c2, %c0_3, %c0_4] : memref<3x32x32xf32, #tpu.memory_space<vmem>>, vector<1x32x32xf32>
    %6 = vector.shape_cast %5 : vector<1x32x32xf32> to vector<32x32xf32>
    %c2_5 = arith.constant 2 : index
    %c0_6 = arith.constant 0 : index
    %c0_7 = arith.constant 0 : index
    %7 = vector.load %arg6[%c2_5, %c0_6, %c0_7] : memref<3x32x4xf32, #tpu.memory_space<vmem>>, vector<1x32x4xf32>
    %8 = vector.shape_cast %7 : vector<1x32x4xf32> to vector<32x4xf32>
    %9 = vector.extract_strided_slice %8 {offsets = [0, 0], sizes = [32, 1], strides = [1, 1]} : vector<32x4xf32> to vector<32x1xf32>
    %10 = vector.extract_strided_slice %8 {offsets = [0, 1], sizes = [32, 1], strides = [1, 1]} : vector<32x4xf32> to vector<32x1xf32>
    %11 = vector.extract_strided_slice %8 {offsets = [0, 2], sizes = [1, 1], strides = [1, 1]} : vector<32x4xf32> to vector<1x1xf32>
    %cst = arith.constant dense<0.000000e+00> : vector<256xf32>
    %12 = vector.multi_reduction <add>, %4, %cst [0] : vector<32x256xf32> to vector<256xf32>
    %13 = vector.shape_cast %12 : vector<256xf32> to vector<1x256xf32>
    %cst_8 = arith.constant 3.200000e+01 : f32
    %14 = vector.broadcast %cst_8 : f32 to vector<1x256xf32>
    %15 = arith.divf %13, %14 : vector<1x256xf32>
    %16 = vector.broadcast %15 : vector<1x256xf32> to vector<32x256xf32>
    %17 = arith.subf %4, %16 : vector<32x256xf32>
    %18 = arith.mulf %17, %17 : vector<32x256xf32>
    %cst_9 = arith.constant dense<0.000000e+00> : vector<256xf32>
    %19 = vector.multi_reduction <add>, %18, %cst_9 [0] : vector<32x256xf32> to vector<256xf32>
    %20 = vector.shape_cast %19 : vector<256xf32> to vector<1x256xf32>
    %cst_10 = arith.constant 3.200000e+01 : f32
    %21 = vector.broadcast %cst_10 : f32 to vector<1x256xf32>
    %22 = arith.divf %20, %21 : vector<1x256xf32>
    %cst_11 = arith.constant 9.99999974E-6 : f32
    %23 = vector.broadcast %cst_11 : f32 to vector<1x256xf32>
    %24 = arith.addf %22, %23 : vector<1x256xf32>
    %25 = math.rsqrt %24 : vector<1x256xf32>
    %26 = vector.broadcast %25 : vector<1x256xf32> to vector<32x256xf32>
    %27 = arith.mulf %17, %26 : vector<32x256xf32>
    %cst_12 = arith.constant dense<0.000000e+00> : vector<32x256xf32>
    %28 = tpu.matmul %6, %27, %cst_12 {dimension_numbers = #tpu.dot_dimension_numbers<[1], [0], [0], [1], [0, 0, 1, 1], [], []>} : vector<32x32xf32>, vector<32x256xf32>, vector<32x256xf32> -> vector<32x256xf32>
    %29 = vector.broadcast %9 : vector<32x1xf32> to vector<32x256xf32>
    %30 = arith.addf %28, %29 : vector<32x256xf32>
    %cst_13 = arith.constant dense<0.000000e+00> : vector<256xf32>
    %31 = vector.multi_reduction <add>, %30, %cst_13 [0] : vector<32x256xf32> to vector<256xf32>
    %32 = vector.shape_cast %31 : vector<256xf32> to vector<1x256xf32>
    %cst_14 = arith.constant 3.200000e+01 : f32
    %33 = vector.broadcast %cst_14 : f32 to vector<1x256xf32>
    %34 = arith.divf %32, %33 : vector<1x256xf32>
    %35 = arith.mulf %30, %30 : vector<32x256xf32>
    %cst_15 = arith.constant dense<0.000000e+00> : vector<256xf32>
    %36 = vector.multi_reduction <add>, %35, %cst_15 [0] : vector<32x256xf32> to vector<256xf32>
    %37 = vector.shape_cast %36 : vector<256xf32> to vector<1x256xf32>
    %cst_16 = arith.constant 3.200000e+01 : f32
    %38 = vector.broadcast %cst_16 : f32 to vector<1x256xf32>
    %39 = arith.divf %37, %38 : vector<1x256xf32>
    %40 = arith.mulf %34, %34 : vector<1x256xf32>
    %41 = arith.subf %39, %40 : vector<1x256xf32>
    %cst_17 = arith.constant 0.000000e+00 : f32
    %42 = vector.broadcast %cst_17 : f32 to vector<1x256xf32>
    %43 = arith.maximumf %41, %42 : vector<1x256xf32>
    %44 = vector.broadcast %10 : vector<32x1xf32> to vector<32x256xf32>
    %45 = arith.mulf %30, %44 : vector<32x256xf32>
    %cst_18 = arith.constant dense<0.000000e+00> : vector<256xf32>
    %46 = vector.multi_reduction <add>, %45, %cst_18 [0] : vector<32x256xf32> to vector<256xf32>
    %47 = vector.shape_cast %46 : vector<256xf32> to vector<1x256xf32>
    %cst_19 = arith.constant 9.99999974E-6 : f32
    %48 = vector.broadcast %cst_19 : f32 to vector<1x256xf32>
    %49 = arith.addf %43, %48 : vector<1x256xf32>
    %50 = math.rsqrt %49 : vector<1x256xf32>
    %51 = arith.mulf %47, %50 : vector<1x256xf32>
    %52 = vector.broadcast %11 : vector<1x1xf32> to vector<1x256xf32>
    %53 = arith.addf %51, %52 : vector<1x256xf32>
    %c0_20 = arith.constant 0 : index
    %c0_21 = arith.constant 0 : index
    %c0_22 = arith.constant 0 : index
    %54 = vector.load %arg18[%c0_20, %c0_21, %c0_22] : memref<1x1x256xf32, #tpu.memory_space<vmem>>, vector<1x1x256xf32>
    %55 = vector.shape_cast %54 : vector<1x1x256xf32> to vector<1x256xf32>
    %56 = vector.shape_cast %53 : vector<1x256xf32> to vector<1x1x256xf32>
    tpu.vector_store %arg18[%c0_20, %c0_21, %c0_22], %56 {strides = array<i32>} : memref<1x1x256xf32, #tpu.memory_space<vmem>>, vector<1x1x256xf32>,
    %c0_23 = arith.constant 0 : index
    %c0_24 = arith.constant 0 : index
    %57 = vector.load %arg19[%c0_23, %c0_24] : memref<16x16xf32, #tpu.memory_space<vmem>>, vector<16x16xf32>
    %c0_25 = arith.constant 0 : index
    %c0_26 = arith.constant 0 : index
    %58 = vector.load %arg11[%c0_25, %c0_26] : memref<16x256xbf16, #tpu.memory_space<vmem>>, vector<16x256xbf16>
    %c0_27 = arith.constant 0 : index
    %c0_28 = arith.constant 0 : index
    %59 = vector.load %arg12[%c0_27, %c0_28] : memref<256x16xbf16, #tpu.memory_space<vmem>>, vector<256x16xbf16>
    %60 = math.exp %53 : vector<1x256xf32>
    %61 = arith.truncf %60 : vector<1x256xf32> to vector<1x256xbf16>
    %62 = vector.broadcast %61 : vector<1x256xbf16> to vector<16x256xbf16>
    %63 = arith.mulf %58, %62 : vector<16x256xbf16>
    %cst_29 = arith.constant dense<0.000000e+00> : vector<16x16xf32>
    %64 = tpu.matmul %63, %59, %cst_29 {dimension_numbers = #tpu.dot_dimension_numbers<[1], [0], [0], [1], [0, 0, 1, 1], [], []>} : vector<16x256xbf16>, vector<256x16xbf16>, vector<16x16xf32> -> vector<16x16xf32>
    %65 = arith.addf %57, %64 : vector<16x16xf32>
    %c0_30 = arith.constant 0 : index
    %c0_31 = arith.constant 0 : index
    %66 = vector.load %arg19[%c0_30, %c0_31] : memref<16x16xf32, #tpu.memory_space<vmem>>, vector<16x16xf32>
    tpu.vector_store %arg19[%c0_30, %c0_31], %65 {strides = array<i32>} : memref<16x16xf32, #tpu.memory_space<vmem>>, vector<16x16xf32>,
    %c0_i32_32 = arith.constant 0 : i32
    %67 = arith.cmpi eq, %arg1, %c0_i32_32 : i32
    %68 = arith.extui %67 : i1 to i32
    %c0_i32_33 = arith.constant 0 : i32
    %69 = arith.cmpi ne, %68, %c0_i32_33 : i32
    scf.if %69 {
      %c0_34 = arith.constant 0 : index
      %c0_35 = arith.constant 0 : index
      %70 = vector.load %arg19[%c0_34, %c0_35] : memref<16x16xf32, #tpu.memory_space<vmem>>, vector<16x16xf32>
      %cst_36 = arith.constant 0.333333343 : f32
      %71 = vector.broadcast %cst_36 : f32 to vector<16x16xf32>
      %72 = arith.mulf %70, %71 : vector<16x16xf32>
      %73 = arith.truncf %72 : vector<16x16xf32> to vector<16x16xbf16>
      %c0_37 = arith.constant 0 : index
      %c0_38 = arith.constant 0 : index
      %74 = vector.load %arg13[%c0_37, %c0_38] : memref<32x16xbf16, #tpu.memory_space<vmem>>, vector<32x16xbf16>
      %cst_39 = arith.constant dense<0.000000e+00> : vector<32x16xf32>
      %75 = tpu.matmul %74, %73, %cst_39 {dimension_numbers = #tpu.dot_dimension_numbers<[1], [0], [0], [1], [0, 0, 1, 1], [], []>} : vector<32x16xbf16>, vector<16x16xbf16>, vector<32x16xf32> -> vector<32x16xf32>
      %76 = arith.truncf %75 : vector<32x16xf32> to vector<32x16xbf16>
      %c0_40 = arith.constant 0 : index
      %c0_41 = arith.constant 0 : index
      %77 = vector.load %arg14[%c0_40, %c0_41] : memref<16x32xbf16, #tpu.memory_space<vmem>>, vector<16x32xbf16>
      %cst_42 = arith.constant dense<0.000000e+00> : vector<32x32xf32>
      %78 = tpu.matmul %76, %77, %cst_42 {dimension_numbers = #tpu.dot_dimension_numbers<[1], [0], [0], [1], [0, 0, 1, 1], [], []>} : vector<32x16xbf16>, vector<16x32xbf16>, vector<32x32xf32> -> vector<32x32xf32>
      %c0_43 = arith.constant 0 : index
      %c0_44 = arith.constant 0 : index
      %c0_45 = arith.constant 0 : index
      %79 = vector.load %arg15[%c0_43, %c0_44, %c0_45] : memref<1x32x32xf32, #tpu.memory_space<vmem>>, vector<1x32x32xf32>
      %80 = vector.shape_cast %79 : vector<1x32x32xf32> to vector<32x32xf32>
      %81 = vector.shape_cast %78 : vector<32x32xf32> to vector<1x32x32xf32>
      tpu.vector_store %arg15[%c0_43, %c0_44, %c0_45], %81 {strides = array<i32>} : memref<1x32x32xf32, #tpu.memory_space<vmem>>, vector<1x32x32xf32>,
    } else {
    }
    return
  }
  func.func @transform_0(%arg0: i32, %arg1: i32) -> (i32, i32, i32) {
    %c0_i32 = arith.constant 0 : i32
    %c0_i32_0 = arith.constant 0 : i32
    %c0_i32_1 = arith.constant 0 : i32
    return %arg0, %c0_i32, %c0_i32_0 : i32, i32, i32
  }
  func.func @transform_1(%arg0: i32, %arg1: i32) -> (i32, i32, i32) {
    %c0_i32 = arith.constant 0 : i32
    %c0_i32_0 = arith.constant 0 : i32
    %c0_i32_1 = arith.constant 0 : i32
    return %arg0, %c0_i32, %c0_i32_0 : i32, i32, i32
  }
  func.func @transform_2(%arg0: i32, %arg1: i32) -> (i32, i32, i32) {
    %c0_i32 = arith.constant 0 : i32
    %c0_i32_0 = arith.constant 0 : i32
    return %arg0, %c0_i32, %arg1 : i32, i32, i32
  }
  func.func @transform_3(%arg0: i32, %arg1: i32) -> (i32, i32, i32) {
    %c0_i32 = arith.constant 0 : i32
    %c0_i32_0 = arith.constant 0 : i32
    %c0_i32_1 = arith.constant 0 : i32
    %c0_i32_2 = arith.constant 0 : i32
    return %c0_i32, %c0_i32_0, %c0_i32_1 : i32, i32, i32
  }
  func.func @transform_4(%arg0: i32, %arg1: i32) -> (i32, i32, i32) {
    %c0_i32 = arith.constant 0 : i32
    %c0_i32_0 = arith.constant 0 : i32
    %c0_i32_1 = arith.constant 0 : i32
    %c0_i32_2 = arith.constant 0 : i32
    return %c0_i32, %c0_i32_0, %c0_i32_1 : i32, i32, i32
  }
  func.func @transform_5(%arg0: i32, %arg1: i32) -> (i32, i32) {
    %c0_i32 = arith.constant 0 : i32
    %c0_i32_0 = arith.constant 0 : i32
    %c0_i32_1 = arith.constant 0 : i32
    return %c0_i32, %c0_i32_0 : i32, i32
  }
  func.func @transform_6(%arg0: i32, %arg1: i32) -> (i32, i32) {
    %c0_i32 = arith.constant 0 : i32
    %c0_i32_0 = arith.constant 0 : i32
    %c0_i32_1 = arith.constant 0 : i32
    return %c0_i32, %c0_i32_0 : i32, i32
  }
  func.func @transform_7(%arg0: i32, %arg1: i32) -> (i32, i32) {
    %c0_i32 = arith.constant 0 : i32
    %c0_i32_0 = arith.constant 0 : i32
    %c0_i32_1 = arith.constant 0 : i32
    return %c0_i32, %c0_i32_0 : i32, i32
  }
  func.func @transform_8(%arg0: i32, %arg1: i32) -> (i32, i32) {
    %c0_i32 = arith.constant 0 : i32
    %c0_i32_0 = arith.constant 0 : i32
    %c0_i32_1 = arith.constant 0 : i32
    return %c0_i32, %c0_i32_0 : i32, i32
  }
  func.func @transform_9(%arg0: i32, %arg1: i32) -> (i32, i32) {
    %c0_i32 = arith.constant 0 : i32
    %c0_i32_0 = arith.constant 0 : i32
    return %c0_i32, %arg1 : i32, i32
  }
  func.func @transform_10(%arg0: i32, %arg1: i32) -> (i32, i32) {
    %c0_i32 = arith.constant 0 : i32
    %c0_i32_0 = arith.constant 0 : i32
    return %arg1, %c0_i32 : i32, i32
  }
  func.func @transform_11(%arg0: i32, %arg1: i32) -> (i32, i32) {
    %c0_i32 = arith.constant 0 : i32
    %c0_i32_0 = arith.constant 0 : i32
    %c0_i32_1 = arith.constant 0 : i32
    return %c0_i32, %c0_i32_0 : i32, i32
  }
  func.func @transform_12(%arg0: i32, %arg1: i32) -> (i32, i32) {
    %c0_i32 = arith.constant 0 : i32
    %c0_i32_0 = arith.constant 0 : i32
    %c0_i32_1 = arith.constant 0 : i32
    return %c0_i32, %c0_i32_0 : i32, i32
  }
  func.func @transform_13(%arg0: i32, %arg1: i32) -> (i32, i32, i32) {
    %c0_i32 = arith.constant 0 : i32
    %c0_i32_0 = arith.constant 0 : i32
    %c0_i32_1 = arith.constant 0 : i32
    return %arg0, %c0_i32, %c0_i32_0 : i32, i32, i32
  }
  func.func @transform_14(%arg0: i32, %arg1: i32) -> (i32, i32, i32) {
    %c0_i32 = arith.constant 0 : i32
    %c0_i32_0 = arith.constant 0 : i32
    %c0_i32_1 = arith.constant 0 : i32
    return %arg0, %c0_i32, %c0_i32_0 : i32, i32, i32
  }
  func.func @transform_15(%arg0: i32, %arg1: i32) -> (i32, i32, i32) {
    %c0_i32 = arith.constant 0 : i32
    %c0_i32_0 = arith.constant 0 : i32
    %c0_i32_1 = arith.constant 0 : i32
    return %arg0, %c0_i32, %c0_i32_0 : i32, i32, i32
  }
  func.func @transform_16(%arg0: i32, %arg1: i32) -> (i32, i32, i32) {
    %c0_i32 = arith.constant 0 : i32
    %c0_i32_0 = arith.constant 0 : i32
    return %arg0, %c0_i32, %arg1 : i32, i32, i32
  }
}

</mosaic_0001>

<bundles_post_ra>
// kernel: tpu_custom_call.1
= control target key start
LH: loop header
LB: loop body
LE: loop exit
PB: predicated region body
PF: predicated region fallthrough
CT: control target
= control target key end

     0   :  { %s3528_s0 = inlined_call_operand.vmem [shape: f32[2,32,16], index: 0, kind: input, shape index: {}]   ;;  %s3529_s1 = inlined_call_operand.vmem [shape: f32[2,32,64], index: 1, kind: input, shape index: {}]   ;;  %s3530_s2 = inlined_call_operand.vmem [shape: f32[2,32,256], index: 2, kind: input, shape index: {}]   ;;  %s3531_s3 = inlined_call_operand.vmem [shape: f32[3,32,32], index: 3, kind: input, shape index: {}]   ;;  %s3532_s4 = inlined_call_operand.vmem [shape: f32[3,32,4], index: 4, kind: input, shape index: {}]   ;;  %s3533_s5 = inlined_call_operand.vmem [shape: bf16[16,16], index: 5, kind: input, shape index: {}]   ;;  %s3534_s6 = inlined_call_operand.vmem [shape: bf16[16,16], index: 6, kind: input, shape index: {}]   ;;  %s3535_s7 = inlined_call_operand.vmem [shape: bf16[16,64], index: 7, kind: input, shape index: {}]   ;;  %s3536_s8 = inlined_call_operand.vmem [shape: bf16[64,16], index: 8, kind: input, shape index: {}]   ;;  %s3537_s9 = inlined_call_operand.vmem [shape: bf16[16,256], index: 9, kind: input, shape index: {}]   ;;  %s3538_s10 = inlined_call_operand.vmem [shape: bf16[256,16], index: 10, kind: input, shape index: {}]   ;;  %s3539_s11 = inlined_call_operand.vmem [shape: bf16[32,16], index: 11, kind: input, shape index: {}]   ;;  %s3540_s12 = inlined_call_operand.vmem [shape: bf16[16,32], index: 12, kind: input, shape index: {}]   ;;  %s3541_s13 = inlined_call_operand.hbm [shape: f32[2,32,32], index: 13, kind: output, shape index: {0}]   ;;  %s3542_s14 = inlined_call_operand.hbm [shape: f32[2,1,16], index: 14, kind: output, shape index: {1}]   ;;  %s3543_s15 = inlined_call_operand.hbm [shape: f32[2,1,64], index: 15, kind: output, shape index: {2}]   ;;  %s3544_s16 = inlined_call_operand.hbm [shape: f32[2,1,256], index: 16, kind: output, shape index: {3}]  }
   0x1   :  { %3556 = sst [smem:[#allocation19_spill]] %s3528_s0 }
   0x2   :  { %3557 = sst [smem:[#allocation20_spill]] %s3529_s1 }
   0x3   :  { %3558 = sst [smem:[#allocation21_spill]] %s3530_s2 }
   0x4   :  { %3559 = sst [smem:[#allocation22_spill]] %s3531_s3 }
   0x5   :  { %3560 = sst [smem:[#allocation23_spill]] %s3532_s4 }
   0x6   :  { %3561 = sst [smem:[#allocation24_spill]] %s3541_s13 }
   0x7   :  { %3562 = sst [smem:[#allocation25_spill]] %s3544_s16 }
   0x8   :  { %22 = vsyncpa [#allocation4], 0 }
   0x9   :  { %24 = vsyncpa [#allocation4 + $0x1], 0 }
   0xa   :  { %25 = vsyncpa [#allocation6], 0 }
   0xb   :  { %27 = vsyncpa [#allocation6 + $0x1], 0 }
   0xc   :  { %28 = vsyncpa [#allocation9], 0 }
   0xd   :  { %30 = vsyncpa [#allocation9 + $0x1], 0  ;;  %s2942_s21 = smov 0   ;;  %s2944_s22 = smov 0  }
   0xe   :  { %s2946_s23 = smov 0   ;;  %s2948_s24 = smov 0  }
   0xf   :  { %s2950_s25 = smov 0   ;;  %s2952_s26 = smov 0  }
  0x10 LB: > { %3563 = sst [smem:[#allocation13_spill]] %s2823_s21  ;;  %s3545_s27 = sadd.s32 4294967295, %s2843_s26   ;;  %s2843_s26 = sphi %s2952_s26, %s36_s26   ;;  %s2839_s25 = sphi %s2950_s25, %s3589_s25   ;;  %s2835_s24 = sphi %s2948_s24, %s3588_s24   ;;  %s2831_s23 = sphi %s2946_s23, %s3592_s23   ;;  %s2827_s22 = sphi %s2944_s22, %s3591_s22   ;;  %s2823_s21 = sphi %s2942_s21, %s3590_s21  }
  0x11   : > { %3564 = sst [smem:[#allocation14_spill]] %s2831_s23  ;;  %s3546_s28 = sadd.s32 4294967294, %s2843_s26  }
  0x12   : > { %3565 = sst [smem:[#allocation15_spill]] %s2839_s25  ;;  %s48_s29 = sadd.s32 1, %s2839_s25 }
  0x13   : > { %s355_s30 = sadd.s32 1, %s2831_s23  ;;  %p50_p0 = scmp.ge.s32.totalorder %s48_s29, 2 }
  0x14   : > { %p365_p1 = scmp.ne.s32.totalorder %s2831_s23, %s2827_s22  ;;  %p366_p2 = scmp.eq.s32.totalorder %s3545_s27, 1 }
  0x15   : > { %p371_p3 = scmp.ne.s32.totalorder %s2827_s22, %s2823_s21  ;;  %s3594_s29 = smov (%p50_p0, %s48_s29), 0 }
  0x16   : > { %3566 = sst [smem:[#allocation16_spill]] %s3594_s29  ;;  %p2984_p4 = por %p366_p2, %p365_p1 }
  0x17   : > { %p372_p5 = scmp.eq.s32.totalorder %s3546_s28, 1  ;;  %s352_s17 = ssub.s32 %s2839_s25, %s3594_s29 }
  0x18   : > { %p2341_p6 = scmp.ge.s32.totalorder %s2843_s26, 1  ;;  %p353_p7 = scmp.eq.s32.totalorder %s352_s17, 0 }
  0x19   : > { %p2993_p8 = por %p372_p5, %p371_p3  ;;  %p541_p9 = scmp.lt.s32.totalorder %s2843_s26, 3 }
  0x1a   : > { %s2999_s19 = scalar_select %p353_p7, %s2831_s23, %s355_s30  }
  0x1b   : > { %s3568_s18 = scalar_select %p2993_p8, 1, 0 }
  0x1c   : > { %3570 = sst [smem:[#allocation18_spill]] %s2999_s19  ;;  %p542_p10 = pnand %p2341_p6, %p541_p9 }
  0x1d   : > { %3569 = sst [smem:[#allocation17_spill]] %s3568_s18  ;;  %p628_p11 = scmp.lt.s32.totalorder (!%p542_p10), %s2835_s24, 1 }
  0x1e   : > { %545 = sbr.rel (%p542_p10) target bundleno = 1309 (0x51d), region = 72  ;;  %s3571_s3 = sld [smem:[#allocation22_spill]] (!%p542_p10) }
  0x1f   : > { %s3572_s4 = sld [smem:[#allocation23_spill]] (!%p542_p10)  ;;  %s3576_s17 = sadd.s32 (!%p542_p10), 4294967295, %s2843_s26  }
  0x20   : > { %s3573_s23 = sld [smem:[#allocation19_spill]] (!%p542_p10)  ;;  %s3404_s25 = sand.u32 (!%p542_p10), 1, %s3576_s17  }
  0x21   : > { %s3574_s1 = sld [smem:[#allocation20_spill]] (!%p542_p10)  ;;  %s3555_s27 = sshll.u32 (!%p542_p10), %s2835_s24, 4 }
  0x22   : > { %s3575_s2 = sld [smem:[#allocation21_spill]] (!%p542_p10)  ;;  %s2089_s16 = scalar_lea.hbm (!%p542_p10), %s3542_s14, %s3555_s27 }
  0x23   : > { %vm742_vm0 = vcmask 261120   ;;  %s3011_s30 = scalar_select %p628_p11, %s2835_s24, 1  ;;  %v2845_v2 = vmov 0   ;;  %vm678_vm1 = vcmask 130048   ;;  %vm932_vm2 = vcmask 523264  }
  0x24   : > { %v670_v0 = vld [vmem:[%s3571_s3] sm:$0xff]  ;;  %2618 = vset.pattern.permute.xlu1 %v2845_v2  ;;  %2617 = vset.pattern.permute.xlu0 %v2845_v2  ;;  %v2846_v28 = vmov 1   ;;  %v2847_v39 = vmov 2   ;;  %vm2849_vm3 = vmmov 0   ;;  %vm916_vm4 = vcmask 122880  }
  0x25   : > { %v2354_v1 = vld [vmem:[%s3571_s3 + $0x20] sm:$0xff]  ;;  %2489 = vmatprep.mubr.msk.f32.mxu0 %vm742_vm0, %v670_v0  ;;  %v676_v3 = vld [vmem:[%s3572_s4 + $0x10] sm:$0xff]  ;;  %s2425_s28 = sshll.u32 %s3011_s30, 5  ;;  %v677_v5 = vld [vmem:[%s3572_s4 + $0x18] sm:$0xff]  ;;  %s2427_s13 = sshll.u32 %s3011_s30, 6  ;;  %vm1168_vm5 = vcmask 516096  }
  0x26   : > { %2503 = vmatprep.mubr.msk.f32.mxu1 %vm742_vm0, %v2354_v1  ;;  %v674_v4 = vld [vmem:[%s3572_s4] sm:$0xff]  ;;  %734 = vperm.xlu1 %2618, %v676_v3   ;;  %s632_s18 = scalar_lea.vmem %s3573_s23, %s2425_s28  ;;  %v675_v6 = vld [vmem:[%s3572_s4 + $0x8] sm:$0xff]  ;;  %v2361_v43 = vld [vmem:[%s3572_s4 + $0x38] sm:$0xff] }
  0x27   : > { %724 = vperm.xlu0 %2617, %v674_v4   ;;  %v666_v7 = vld [vmem:[%s632_s18] sm:$0xff]  ;;  %v667_v8 = vld [vmem:[%s632_s18 + $0x8] sm:$0xff]  ;;  %v668_v9 = vld [vmem:[%s632_s18 + $0x10] sm:$0xff]  ;;  %s637_s20 = scalar_lea.vmem %s3574_s1, %s2425_s28 }
  0x28   : > { %v669_v10 = vld [vmem:[%s632_s18 + $0x18] sm:$0xff]  ;;  %v679_v11 = vsel %vm678_vm1, %v666_v7, 0.0  ;;  %v680_v12 = vsel %vm678_vm1, %v667_v8, 0.0  ;;  %v682_v13 = vsel %vm678_vm1, %v668_v9, 0.0  ;;  %v918_v14 = vld [vmem:[%s637_s20] sm:$0xff]  ;;  %v919_v15 = vld [vmem:[%s637_s20 + $0x8] sm:$0xff]  ;;  %s3153_s23 = scalar_lea.vmem %s3575_s2, %s2427_s13 }
  0x29   : > { %v681_v16 = vadd.f32 %v680_v12, %v679_v11  ;;  %v684_v17 = vsel %vm678_vm1, %v669_v10, 0.0  ;;  %v920_v18 = vld [vmem:[%s637_s20 + $0x10] sm:$0xff]  ;;  %v921_v19 = vld [vmem:[%s637_s20 + $0x18] sm:$0xff]  ;;  %v933_v20 = vsel %vm932_vm2, %v918_v14, 0.0  ;;  %v934_v21 = vsel %vm932_vm2, %v919_v15, 0.0  ;;  %v3047_v36 = vld [vmem:[%s3572_s4 + $0x20] sm:$0xff] }
  0x2a   : > { %739 = vperm.xlu1 %2618, %v677_v5   ;;  %v935_v22 = vadd.f32 %v934_v21, %v933_v20  ;;  %v936_v23 = vsel %vm932_vm2, %v920_v18, 0.0  ;;  %v938_v24 = vsel %vm932_vm2, %v921_v19, 0.0  ;;  %v2359_v41 = vld [vmem:[%s3572_s4 + $0x28] sm:$0xff]  ;;  %v2360_v52 = vld [vmem:[%s3572_s4 + $0x30] sm:$0xff] }
  0x2b   : > { %729 = vperm.xlu0 %2617, %v675_v6   ;;  %v683_v25 = vadd.f32 %v682_v13, %v681_v16 }
  0x2c   : > { %v937_v26 = vadd.f32 %v936_v23, %v935_v22 }
  0x2d   : > { %v685_v27 = vadd.f32 %v684_v17, %v683_v25 }
  0x2e   : > { %2620 = vset.pattern.permute.xlu1 %v2846_v28  ;;  %v939_v29 = vadd.f32 %v938_v24, %v937_v26  ;;  %v2382_v24 = vld [vmem:[%s3572_s4 + $0x48] sm:$0xff] }
  0x2f   : > { %2619 = vset.pattern.permute.xlu0 %v2846_v28  ;;  %880 = vperm.xlu1 %2620, %v675_v6   ;;  %v686_v30 = vrot.slane %v685_v27, 4 }
  0x30   : > { %876 = vperm.xlu0 %2619, %v674_v4   ;;  %v940_v31 = vrot.slane %v939_v29, 4 }
  0x31   : > { %v687_v32 = vadd.f32 %v686_v30, %v685_v27  ;;  %v2383_v30 = vld [vmem:[%s3572_s4 + $0x50] sm:$0xff] }
  0x32   : > { %v941_v33 = vadd.f32 %v940_v31, %v939_v29 }
  0x33   : > { %884 = vperm.xlu1 %2620, %v676_v3   ;;  %v688_v34 = vrot.slane %v687_v32, 2 }
  0x34   : > { %888 = vperm.xlu0 %2619, %v677_v5   ;;  %v942_v35 = vrot.slane %v941_v33, 2 }
  0x35   : > { %v689_v37 = vadd.f32 %v688_v34, %v687_v32 }
  0x36   : > { %v943_v38 = vadd.f32 %v942_v35, %v941_v33 }
  0x37   : > { %2621 = vset.pattern.permute.xlu1 %v2847_v39  ;;  %v690_v40 = vrot.slane %v689_v37, 1 }
  0x38   : > { %2622 = vset.pattern.permute.xlu0 %v2845_v2  ;;  %912 = vperm.xlu1 %2621, %v674_v4   ;;  %v944_v42 = vrot.slane %v943_v38, 1 }
  0x39   : > { %977 = vperm.xlu0 %2622, %v3047_v36   ;;  %v691_v44 = vadd.f32 %v690_v40, %v689_v37 }
  0x3a   : > { %v945_v45 = vadd.f32 %v944_v42, %v943_v38 }
  0x3b   : > { %v693_v46 = vmul.f32 0.03125, %v691_v44 }
  0x3c   : > { %2623 = vset.pattern.permute.xlu1 %v2845_v2  ;;  %v946_v47 = vmul.f32 0.03125, %v945_v45  ;;  %v671_v45 = vld [vmem:[%s3571_s3 + $0x8] sm:$0xff] }
  0x3d   : > { %992 = vperm.xlu0 %2622, %v2361_v43   ;;  %982 = vperm.xlu1 %2623, %v2359_v41   ;;  %v3059_v48 = vsub.f32 %v666_v7, %v693_v46  ;;  %v3061_v49 = vsub.f32 %v667_v8, %v693_v46  ;;  %v3063_v50 = vsub.f32 %v668_v9, %v693_v46 }
  0x3e   : > { %v3065_v51 = vsub.f32 %v669_v10, %v693_v46  ;;  %v3070_v53 = vsub.f32 %v918_v14, %v946_v47  ;;  %v3072_v54 = vsub.f32 %v919_v15, %v946_v47  ;;  %v3074_v55 = vsub.f32 %v920_v18, %v946_v47  ;;  %v2355_v46 = vld [vmem:[%s3571_s3 + $0x28] sm:$0xff] }
  0x3f   : > { %v3076_v56 = vsub.f32 %v921_v19, %v946_v47  ;;  %v698_v57 = vmul.f32 %v3059_v48, %v3059_v48  ;;  %v699_v58 = vmul.f32 %v3061_v49, %v3061_v49  ;;  %v700_v59 = vmul.f32 %v3063_v50, %v3063_v50  ;;  %v672_v47 = vld [vmem:[%s3571_s3 + $0x10] sm:$0xff] }
  0x40   : > { %v701_v60 = vmul.f32 %v3065_v51, %v3065_v51  ;;  %v951_v61 = vmul.f32 %v3070_v53, %v3070_v53  ;;  %v952_v62 = vmul.f32 %v3072_v54, %v3072_v54  ;;  %v953_v63 = vmul.f32 %v3074_v55, %v3074_v55 }
  0x41   : > { %2625 = vset.pattern.permute.xlu0 %v2846_v28  ;;  %v954_v0 = vmul.f32 %v3076_v56, %v3076_v56  ;;  %987 = vperm.xlu1 %2623, %v2360_v52   ;;  %v702_v1 = vsel %vm678_vm1, %v698_v57, 0.0  ;;  %v703_v3 = vsel %vm678_vm1, %v699_v58, 0.0  ;;  %v705_v4 = vsel %vm678_vm1, %v700_v59, 0.0 }
  0x42   : > { %1132 = vperm.xlu0 %2625, %v2359_v41   ;;  %v704_v5 = vadd.f32 %v703_v3, %v702_v1  ;;  %v955_v6 = vsel %vm932_vm2, %v951_v61, 0.0  ;;  %v956_v7 = vsel %vm932_vm2, %v952_v62, 0.0  ;;  %v958_v8 = vsel %vm932_vm2, %v953_v63, 0.0 }
  0x43   : > { %v707_v9 = vsel %vm678_vm1, %v701_v60, 0.0  ;;  %v957_v10 = vadd.f32 %v956_v7, %v955_v6  ;;  %v960_v12 = vsel %vm932_vm2, %v954_v0, 0.0 }
  0x44   : > { %v706_v11 = vadd.f32 %v705_v4, %v704_v5 }
  0x45   : > { %2624 = vset.pattern.permute.xlu1 %v2846_v28  ;;  %v959_v13 = vadd.f32 %v958_v8, %v957_v10 }
  0x46   : > { %1128 = vperm.xlu1 %2624, %v3047_v36   ;;  %2626 = vset.pattern.permute.xlu0 %v2845_v2  ;;  %v708_v14 = vadd.f32 %v707_v9, %v706_v11 }
  0x47   : > { %v961_v15 = vadd.f32 %v960_v12, %v959_v13 }
  0x48   : > { %v709_v16 = vrot.slane %v708_v14, 4 }
  0x49   : > { %v962_v17 = vrot.slane %v961_v15, 4 }
  0x4a   : > { %1136 = vperm.xlu1 %2624, %v2360_v52   ;;  %v710_v18 = vadd.f32 %v709_v16, %v708_v14  ;;  %v1349_v52 = vld [vmem:[%s3153_s23 + $0x18] sm:$0xff] }
  0x4b   : > { %v963_v19 = vadd.f32 %v962_v17, %v961_v15 }
  0x4c   : > { %v711_v20 = vrot.slane %v710_v18, 2 }
  0x4d   : > { %v964_v21 = vrot.slane %v963_v19, 2 }
  0x4e   : > { %1140 = vperm.xlu1 %2624, %v2361_v43   ;;  %v712_v22 = vadd.f32 %v711_v20, %v710_v18 }
  0x4f   : > { %v965_v23 = vadd.f32 %v964_v21, %v963_v19  ;;  %v2633_v21 = vld [vmem:[%s3536_s8 + $0x18] sm:$0xff]  }
  0x50   : > { %v713_v25 = vrot.slane %v712_v22, 1 }
  0x51   : > { %v966_v26 = vrot.slane %v965_v23, 1 }
  0x52   : > { %2627 = vset.pattern.permute.xlu1 %v2845_v2  ;;  %v714_v27 = vadd.f32 %v713_v25, %v712_v22  ;;  %v2848_v22 = vmov 0.0   ;;  %v1346_v25 = vld [vmem:[%s3153_s23] sm:$0xff] }
  0x53   : > { %1440 = vperm.xlu1 %2627, %v2382_v24   ;;  %v967_v29 = vadd.f32 %v966_v26, %v965_v23  ;;  %v2634_v23 = vld [vmem:[%s3536_s8 + $0x10] sm:$0xff]   ;;  %v2636_v26 = vld [vmem:[%s3536_s8] sm:$0xff]  }
  0x54   : > { %v715_v31 = vmul.f32 0.03125, %v714_v27  ;;  %v2637_v27 = vld [vmem:[%s3534_s6] sm:$0xff]  }
  0x55   : > { %v968_v32 = vmul.f32 0.03125, %v967_v29  ;;  %v1348_v29 = vld [vmem:[%s3153_s23 + $0x10] sm:$0xff] }
  0x56   : > { %v716_v33 = vadd.f32 1e-05, %v715_v31 }
  0x57   : > { %1445 = vperm.xlu1 %2627, %v2383_v30   ;;  %v969_v34 = vadd.f32 1e-05, %v968_v32  ;;  %v1364_v32 = vadd.f32 %v1348_v29, %v1346_v25 }
  0x58   : > { %2657 = vrsqrt.f32 %v716_v33  ;;  %v1350_v33 = vld [vmem:[%s3153_s23 + $0x20] sm:$0xff] }
  0x59   : > { %2659 = vrsqrt.f32 %v969_v34 }
  0x5b   : > { %2628 = vset.pattern.permute.xlu1 %v2847_v39 }
  0x5c   : > { %1164 = vperm.xlu1 %2628, %v3047_v36  }
  0x60   : > { %2630 = vset.pattern.permute.xlu1 %v2846_v28 }
  0x61   : > { %1614 = vperm.xlu1 %2630, %v2382_v24   ;;  %v2635_v24 = vld [vmem:[%s3536_s8 + $0x8] sm:$0xff]  }
  0x65   : > { %1618 = vperm.xlu1 %2630, %v2383_v30   ;;  %v2658_v2 = vpop.eup %2657 }
  0x66   : > { %v2660_v35 = vpop.eup %2659  ;;  %v721_v37 = vmul.f32 %v2658_v2, %v3065_v51  ;;  %v720_v38 = vmul.f32 %v2658_v2, %v3063_v50  ;;  %v719_v42 = vmul.f32 %v2658_v2, %v3061_v49  ;;  %v718_v43 = vmul.f32 %v2658_v2, %v3059_v48  ;;  %v2356_v48 = vld [vmem:[%s3571_s3 + $0x30] sm:$0xff]  ;;  %v673_v49 = vld [vmem:[%s3571_s3 + $0x18] sm:$0xff]  ;;  %v1347_v51 = vld [vmem:[%s3153_s23 + $0x8] sm:$0xff] }
  0x67   : > { %v974_v40 = vmul.f32 %v2660_v35, %v3076_v56  ;;  %v973_v41 = vmul.f32 %v2660_v35, %v3074_v55  ;;  %v972_v36 = vmul.f32 %v2660_v35, %v3072_v54  ;;  %v971_v44 = vmul.f32 %v2660_v35, %v3070_v53  ;;  %v2357_v50 = vld [vmem:[%s3571_s3 + $0x38] sm:$0xff]  ;;  %v1351_v54 = vld [vmem:[%s3153_s23 + $0x28] sm:$0xff] }
  0x68   : > { %2481 = vmatprep.subr.mxu0 %v721_v37  ;;  %v1373_v53 = vadd.f32 %v1349_v52, %v1347_v51  ;;  %v1353_v56 = vld [vmem:[%s3153_s23 + $0x38] sm:$0xff] }
  0x69   : > { %2631 = vset.pattern.permute.xlu1 %v2847_v39  ;;  %2495 = vmatprep.subr.mxu1 %v974_v40 }
  0x6a   : > { %2482 = vmatpush3.msra.mxu0 %v721_v37  ;;  %2496 = vmatpush3.msra.mxu1 %v974_v40  ;;  %v1374_v55 = vadd.f32 %v1373_v53, %v1351_v54  ;;  %v1365_v37 = vadd.f32 %v1364_v32, %v1350_v33 }
  0x6b   : > { %2483 = vmatprep.subr.mxu0 %v720_v38  ;;  %2497 = vmatprep.subr.mxu1 %v973_v41 }
  0x6c   : > { %2484 = vmatpush3.msra.mxu0 %v720_v38  ;;  %2498 = vmatpush3.msra.mxu1 %v973_v41  ;;  %v1375_v57 = vadd.f32 %v1374_v55, %v1353_v56  ;;  %v1352_v38 = vld [vmem:[%s3153_s23 + $0x30] sm:$0xff]  ;;  %s3261_s23 = sand.u32 1, %s2827_s22  }
  0x6d   : > { %2485 = vmatprep.subr.mxu0 %v719_v42  ;;  %2499 = vmatprep.subr.mxu1 %v972_v36  ;;  %v1366_v41 = vadd.f32 %v1365_v37, %v1352_v38  ;;  %s614_s19 = scalar_lea.vmem [#allocation5], %s3261_s23  ;;  %s3554_s28 = scalar_lea.vmem [#allocation7], %s3261_s23 }
  0x6e   : > { %2486 = vmatpush3.msra.mxu0 %v719_v42  ;;  %2500 = vmatpush3.msra.mxu1 %v972_v36  ;;  %v1376_v58 = vrot.slane %v1375_v57, 4  ;;  %s2343_s30 = sshll.u32 %s3261_s23, 1  ;;  %s2091_s21 = sshll.u32 %s614_s19, 4  ;;  %s2092_s21 = int_to_ptr.vmem [resolvable:$true] %s2091_s21 }
  0x6f   : > { %2487 = vmatprep.subr.mxu0 %v718_v43  ;;  %2501 = vmatprep.subr.mxu1 %v971_v44  ;;  %v1367_v42 = vrot.slane %v1366_v41, 4  ;;  %s3376_s18 = scalar_lea.vmem [#allocation8], %s2343_s30  ;;  %s2681_s29 = scalar_lea.vmem %s2092_s21, 16 }
  0x70   : > { %2488 = vmatpush3.msra.mxu0 %v718_v43  ;;  %2502 = vmatpush3.msra.mxu1 %v971_v44  ;;  %v1377_v59 = vadd.f32 %v1376_v58, %v1375_v57  ;;  %p2682_p12 = scmp.ne.s32.totalorder %s2092_s21, %s2681_s29 }
  0x71   : > { %2490 = vmatmul.mubr.msk.f32.vlgmr.msra.gmra.mxu0 %vm742_vm0, %v671_v45  ;;  %2504 = vmatmul.mubr.msk.f32.vlgmr.msra.gmra.mxu1 %vm742_vm0, %v2355_v46  ;;  %v1368_v44 = vadd.f32 %v1367_v42, %v1366_v41  ;;  %v2381_v45 = vld [vmem:[%s3572_s4 + $0x40] sm:$0xff] }
  0x72   : > { %2492 = vmatprep.mubr.msk.f32.mxu0 %vm742_vm0, %v672_v47  ;;  %2506 = vmatprep.mubr.msk.f32.mxu1 %vm742_vm0, %v2356_v48  ;;  %v1378_v60 = vrot.slane %v1377_v59, 2  ;;  %v2384_v48 = vld [vmem:[%s3572_s4 + $0x58] sm:$0xff]  ;;  %p2683_p13 = pnand %p2682_p12, %p2984_p4 }
  0x73   : > { %2509 = vmatprep.subr.bf16.mxu0 %v2848_v22  ;;  %2521 = vmatprep.subr.bf16.mxu1 %v2848_v22  ;;  %v1369_v47 = vrot.slane %v1368_v44, 2 }
  0x74   : > { %v1379_v61 = vadd.f32 %v1378_v60, %v1377_v59  ;;  %2510 = vmatpush3.bf16.msra.mxu0 %v2633_v21  ;;  %2522 = vmatpush3.bf16.msra.mxu1 %v2637_v27  ;;  %p2684_p0 = pneg %p2683_p13 }
  0x75   : > { %2493 = vmatmul.mubr.msk.f32.gmra.mxu0 %vm742_vm0, %v673_v49  ;;  %2507 = vmatmul.mubr.msk.f32.gmra.mxu1 %vm742_vm0, %v2357_v50  ;;  %v1370_v50 = vadd.f32 %v1369_v47, %v1368_v44 }
  0x76   : > { %v1380_v62 = vrot.slane %v1379_v61, 1  ;;  %2511 = vmatprep.subr.bf16.mxu0 %v2848_v22  ;;  %2517 = vmatprep.mubr.msk.bf16.mxu0 %vm2849_vm3, %v2848_v22 }
  0x77   : > { %2523 = vmatprep.mubr.msk.bf16.mxu1 %vm2849_vm3, %v2848_v22  ;;  %1435 = vperm.xlu0 %2626, %v2381_v45   ;;  %v1371_v53 = vrot.slane %v1370_v50, 1 }
  0x78   : > { %v1381_v63 = vadd.f32 %v1380_v62, %v1379_v61  ;;  %2512 = vmatpush3.bf16.msra.mxu0 %v2634_v23  ;;  %1658 = vperm.xlu1 %2631, %v2381_v45  }
  0x79   : > { %2513 = vmatprep.subr.bf16.mxu0 %v2848_v22  ;;  %v1372_v55 = vadd.f32 %v1371_v53, %v1370_v50 }
  0x7a   : > { %v1384_v0 = vmul.f32 0.03125, %v1381_v63 }
  0x7b   : > { %1450 = vperm.xlu0 %2626, %v2384_v48   ;;  %v1383_v57 = vmul.f32 0.03125, %v1372_v55 }
  0x7c   : > { %v1386_v1 = vsub.f32 %v1347_v51, %v1384_v0  ;;  %v1388_v3 = vsub.f32 %v1349_v52, %v1384_v0  ;;  %v1390_v4 = vsub.f32 %v1351_v54, %v1384_v0  ;;  %v1392_v7 = vsub.f32 %v1353_v56, %v1384_v0  ;;  %2514 = vmatpush3.bf16.msra.mxu0 %v2635_v24 }
  0x7d   : > { %2515 = vmatprep.subr.bf16.mxu0 %v2848_v22  ;;  %v3207_v60 = vsub.f32 %v1346_v25, %v1383_v57  ;;  %v3209_v61 = vsub.f32 %v1348_v29, %v1383_v57  ;;  %v3211_v0 = vsub.f32 %v1350_v33, %v1383_v57 }
  0x7e   : > { %v1394_v5 = vmul.f32 %v1386_v1, %v1386_v1  ;;  %v1396_v6 = vmul.f32 %v1388_v3, %v1388_v3  ;;  %v1398_v8 = vmul.f32 %v1390_v4, %v1390_v4  ;;  %v1400_v10 = vmul.f32 %v1392_v7, %v1392_v7 }
  0x7f   : > { %2629 = vset.pattern.permute.xlu0 %v2846_v28 }
  0x80   : > { %v1410_v9 = vadd.f32 %v1396_v6, %v1394_v5  ;;  %2516 = vmatpush3.bf16.msra.mxu0 %v2636_v26  ;;  %1610 = vperm.xlu0 %2629, %v2381_v45  }
  0x82   : > { %v1411_v11 = vadd.f32 %v1410_v9, %v1398_v8 }
  0x84   : > { %v1412_v12 = vadd.f32 %v1411_v11, %v1400_v10  ;;  %1622 = vperm.xlu0 %2629, %v2384_v48  }
  0x86   : > { %v1413_v13 = vrot.slane %v1412_v12, 4 }
  0x88   : > { %v1414_v14 = vadd.f32 %v1413_v13, %v1412_v12  ;;  %2632 = vset.pattern.permute.xlu0 %v2847_v39  ;;  %v3217_v12 = vsub.f32 %v1352_v38, %v1383_v57 }
  0x8a   : > { %v1415_v15 = vrot.slane %v1414_v14, 2 }
  0x8c   : > { %v1416_v16 = vadd.f32 %v1415_v15, %v1414_v14 }
  0x8e   : > { %v1417_v17 = vrot.slane %v1416_v16, 1 }
  0x90   : > { %v1418_v18 = vadd.f32 %v1417_v17, %v1416_v16  ;;  %v3222_v17 = vmul.f32 %v3211_v0, %v3211_v0 }
  0x92   : > { %v1420_v19 = vmul.f32 0.03125, %v1418_v18 }
  0x94   : > { %v1422_v20 = vadd.f32 1e-05, %v1420_v19 }
  0x96   : > { %2661 = vrsqrt.f32 %v1422_v20 }
  0xa1   : > { %v3191_v40 = vpop.permute.xlu1 %734 }
  0xa2   : > { %v725_v43 = vpop.permute.xlu0 %724 }
  0xa3   : > { %v2662_v30 = vpop.eup %2661 }
  0xa4   : > { %v1432_v31 = vmul.f32 %v2662_v30, %v1392_v7  ;;  %v3184_v34 = vmul.f32 %v2662_v30, %v1390_v4  ;;  %v3186_v2 = vmul.f32 %v2662_v30, %v1388_v3  ;;  %v3188_v35 = vmul.f32 %v2662_v30, %v1386_v1 }
  0xa5   : > { %v740_v36 = vpop.permute.xlu1 %739  ;;  %v1393_v1 = vmul.f32 %v3207_v60, %v3207_v60  ;;  %v1395_v3 = vmul.f32 %v3209_v61, %v3209_v61 }
  0xa6   : > { %1490 = vmatprep.subr.mxu1 %v1432_v31  ;;  %v730_v49 = vpop.permute.xlu0 %729 }
  0xa7   : > { %v3224_v18 = vadd.f32 %v1395_v3, %v1393_v1 }
  0xaa   : > { %v881_v46 = vpop.permute.xlu1 %880 }
  0xab   : > { %v877_v52 = vpop.permute.xlu0 %876 }
  0xae   : > { %v3199_v51 = vpop.permute.xlu1 %884 }
  0xaf   : > { %v3204_v56 = vpop.permute.xlu0 %888 }
  0xb3   : > { %v3202_v54 = vpop.permute.xlu1 %912 }
  0xb4   : > { %v978_v59 = vpop.permute.xlu0 %977 }
  0xb8   : > { %v983_v58 = vpop.permute.xlu1 %982  ;;  %v993_v6 = vpop.permute.xlu0 %992 }
  0xbc   : > { %v988_v28 = vpop.permute.xlu1 %987 }
  0xbd   : > { %v1133_v25 = vpop.permute.xlu0 %1132 }
  0xc1   : > { %v1129_v16 = vpop.permute.xlu1 %1128 }
  0xc5   : > { %v1137_v55 = vpop.permute.xlu1 %1136 }
 0x131   : > { %v2491_v62 = vpop.f32.mrf.mxu0  ;;  %v2505_v63 = vpop.f32.mrf.mxu1 }
 0x132   : > { %v827_v4 = vadd.f32 %v2491_v62, %v730_v49  ;;  %v1079_v5 = vadd.f32 %v2505_v63, %v983_v58 }
 0x133   : > { %v821_v39 = vpop.f32.mrf.mxu0  ;;  %v1073_v8 = vpop.f32.mrf.mxu1 }
 0x134   : > { %v822_v7 = vadd.f32 %v821_v39, %v725_v43  ;;  %v1107_v9 = vmul.f32 %v1079_v5, %v1079_v5  ;;  %v1074_v10 = vadd.f32 %v1073_v8, %v978_v59  ;;  %v1093_v13 = vsel %vm932_vm2, %v1079_v5, 0.0 }
 0x135   : > { %v2494_v11 = vpop.f32.mrf.mxu0  ;;  %v2508_v15 = vpop.f32.mrf.mxu1  ;;  %v841_v19 = vsel %vm678_vm1, %v827_v4, 0.0  ;;  %v855_v20 = vmul.f32 %v827_v4, %v827_v4  ;;  %v892_v26 = vmul.f32 %v881_v46, %v827_v4  ;;  %v1144_v44 = vmul.f32 %v1133_v25, %v1079_v5 }
 0x136   : > { %v854_v14 = vmul.f32 %v822_v7, %v822_v7  ;;  %v840_v21 = vsel %vm678_vm1, %v822_v7, 0.0  ;;  %v1092_v23 = vsel %vm932_vm2, %v1074_v10, 0.0  ;;  %v1111_v27 = vsel %vm932_vm2, %v1107_v9, 0.0 }
 0x137   : > { %v831_v24 = vpop.f32.mrf.mxu0  ;;  %v1106_v29 = vmul.f32 %v1074_v10, %v1074_v10  ;;  %v837_v30 = vadd.f32 %v2494_v11, %v740_v36  ;;  %v1083_v31 = vpop.f32.mrf.mxu1  ;;  %v1094_v33 = vadd.f32 %v1093_v13, %v1092_v23  ;;  %v842_v41 = vadd.f32 %v841_v19, %v840_v21 }
 0x138   : > { %v858_v32 = vsel %vm678_vm1, %v854_v14, 0.0  ;;  %v832_v37 = vadd.f32 %v831_v24, %v3191_v40  ;;  %v1084_v38 = vadd.f32 %v1083_v31, %v988_v28  ;;  %v891_v42 = vmul.f32 %v877_v52, %v822_v7 }
 0x139   : > { %v1110_v43 = vsel %vm932_vm2, %v1106_v29, 0.0  ;;  %v859_v45 = vsel %vm678_vm1, %v855_v20, 0.0  ;;  %v857_v47 = vmul.f32 %v837_v30, %v837_v30  ;;  %v845_v40 = vsel %vm678_vm1, %v837_v30, 0.0 }
 0x13a   : > { %v843_v46 = vsel %vm678_vm1, %v832_v37, 0.0  ;;  %v856_v48 = vmul.f32 %v832_v37, %v832_v37  ;;  %v860_v49 = vadd.f32 %v859_v45, %v858_v32  ;;  %v1112_v36 = vadd.f32 %v1111_v27, %v1110_v43 }
 0x13b   : > { %v844_v50 = vadd.f32 %v843_v46, %v842_v41  ;;  %v1095_v53 = vsel %vm932_vm2, %v1084_v38, 0.0  ;;  %v1108_v58 = vmul.f32 %v1084_v38, %v1084_v38  ;;  %v895_v59 = vsel %vm678_vm1, %v891_v42, 0.0 }
 0x13c   : > { %v861_v57 = vsel %vm678_vm1, %v856_v48, 0.0  ;;  %v1096_v52 = vadd.f32 %v1095_v53, %v1094_v33  ;;  %v1089_v28 = vadd.f32 %v2508_v15, %v993_v6  ;;  %v863_v1 = vsel %vm678_vm1, %v857_v47, 0.0 }
 0x13d   : > { %v846_v62 = vadd.f32 %v845_v40, %v844_v50  ;;  %v862_v63 = vadd.f32 %v861_v57, %v860_v49  ;;  %v893_v3 = vmul.f32 %v3199_v51, %v832_v37  ;;  %v1113_v4 = vsel %vm932_vm2, %v1108_v58, 0.0  ;;  %v1141_v51 = vpop.permute.xlu1 %1140 }
 0x13e   : > { %v1143_v5 = vmul.f32 %v1129_v16, %v1074_v10  ;;  %v1114_v8 = vadd.f32 %v1113_v4, %v1112_v36  ;;  %v1097_v9 = vsel %vm932_vm2, %v1089_v28, 0.0  ;;  %v1109_v13 = vmul.f32 %v1089_v28, %v1089_v28 }
 0x13f   : > { %v847_v39 = vrot.slane %v846_v62, 4  ;;  %v864_v7 = vadd.f32 %v863_v1, %v862_v63  ;;  %v1098_v11 = vadd.f32 %v1097_v9, %v1096_v52  ;;  %v1145_v19 = vmul.f32 %v1137_v55, %v1084_v38 }
 0x140   : > { %v1147_v14 = vsel %vm932_vm2, %v1143_v5, 0.0  ;;  %v896_v20 = vsel %vm678_vm1, %v892_v26, 0.0  ;;  %v1148_v21 = vsel %vm932_vm2, %v1144_v44, 0.0  ;;  %v898_v10 = vsel %vm678_vm1, %v893_v3, 0.0 }
 0x141   : > { %v848_v6 = vadd.f32 %v847_v39, %v846_v62  ;;  %v865_v15 = vrot.slane %v864_v7, 4  ;;  %v897_v23 = vadd.f32 %v896_v20, %v895_v59  ;;  %v1099_v16 = vrot.slane %v1098_v11, 4 }
 0x142   : > { %v1115_v24 = vsel %vm932_vm2, %v1109_v13, 0.0  ;;  %v1149_v31 = vadd.f32 %v1148_v21, %v1147_v14  ;;  %v894_v32 = vmul.f32 %v3204_v56, %v837_v30  ;;  %v1150_v26 = vsel %vm932_vm2, %v1145_v19, 0.0 }
 0x143   : > { %v849_v25 = vrot.slane %v848_v6, 2  ;;  %v866_v27 = vadd.f32 %v865_v15, %v864_v7  ;;  %v1116_v29 = vadd.f32 %v1115_v24, %v1114_v8  ;;  %v1100_v33 = vadd.f32 %v1099_v16, %v1098_v11 }
 0x144   : > { %v1146_v37 = vmul.f32 %v1141_v51, %v1089_v28  ;;  %v899_v42 = vadd.f32 %v898_v10, %v897_v23  ;;  %v1399_v45 = vmul.f32 %v3217_v12, %v3217_v12  ;;  %v1151_v49 = vadd.f32 %v1150_v26, %v1149_v31 }
 0x145   : > { %v850_v38 = vadd.f32 %v849_v25, %v848_v6  ;;  %v867_v41 = vrot.slane %v866_v27, 2  ;;  %v1117_v43 = vrot.slane %v1116_v29, 4  ;;  %v1101_v44 = vrot.slane %v1100_v33, 2 }
 0x146   : > { %v900_v36 = vsel %vm678_vm1, %v894_v32, 0.0  ;;  %v1152_v56 = vsel %vm932_vm2, %v1146_v37, 0.0  ;;  %v1402_v30 = vadd.f32 %v3224_v18, %v3222_v17 }
 0x147   : > { %v851_v47 = vrot.slane %v850_v38, 1  ;;  %v868_v46 = vadd.f32 %v867_v41, %v866_v27  ;;  %v1118_v48 = vadd.f32 %v1117_v43, %v1116_v29  ;;  %v1102_v50 = vadd.f32 %v1101_v44, %v1100_v33  ;;  %v3256_v27 = vpop.permute.xlu1 %1440 }
 0x148   : > { %v901_v40 = vadd.f32 %v900_v36, %v899_v42  ;;  %v1153_v63 = vadd.f32 %v1152_v56, %v1151_v49  ;;  %v1403_v1 = vadd.f32 %v1402_v30, %v1399_v45 }
 0x149   : > { %v852_v53 = vadd.f32 %v851_v47, %v850_v38  ;;  %v869_v55 = vrot.slane %v868_v46, 1  ;;  %v1119_v57 = vrot.slane %v1118_v48, 2  ;;  %v1103_v52 = vrot.slane %v1102_v50, 1 }
 0x14a   : > { %v902_v5 = vrot.slane %v901_v40, 4  ;;  %v1154_v11 = vrot.slane %v1153_v63, 4  ;;  %v1404_v18 = vrot.slane %v1403_v1, 4 }
 0x14b   : > { %v853_v58 = vmul.f32 0.03125, %v852_v53  ;;  %v870_v59 = vadd.f32 %v869_v55, %v868_v46  ;;  %v1120_v62 = vadd.f32 %v1119_v57, %v1118_v48  ;;  %v1104_v28 = vadd.f32 %v1103_v52, %v1102_v50  ;;  %v3258_v26 = vpop.permute.xlu1 %1445 }
 0x14c   : > { %v903_v14 = vadd.f32 %v902_v5, %v901_v40  ;;  %v1155_v15 = vadd.f32 %v1154_v11, %v1153_v63  ;;  %v1405_v21 = vadd.f32 %v1404_v18, %v1403_v1  ;;  %v1180_v53 = vlaneseq  ;;  %v1170_v63 = vld [vmem:[%s3533_s5] sm:$0xf] }
 0x14d   : > { %v871_v3 = vmul.f32 0.03125, %v870_v59  ;;  %v872_v4 = vmul.f32 %v853_v58, %v853_v58  ;;  %v1121_v39 = vrot.slane %v1120_v62, 1  ;;  %v1105_v7 = vmul.f32 0.03125, %v1104_v28  ;;  %v1171_v28 = vld [vmem:[%s3533_s5 + $0x4] sm:$0xf] }
 0x14e   : > { %v904_v51 = vrot.slane %v903_v14, 2  ;;  %v1156_v16 = vrot.slane %v1155_v15, 2  ;;  %v1406_v24 = vrot.slane %v1405_v21, 2  ;;  %vm1683_vm6 = vcmp.lt.s32.totalorder %v1180_v53, 256 }
 0x14f   : > { %v873_v8 = vsub.f32 %v871_v3, %v872_v4  ;;  %v1122_v9 = vadd.f32 %v1121_v39, %v1120_v62  ;;  %v1124_v17 = vmul.f32 %v1105_v7, %v1105_v7  ;;  %v1165_v46 = vpop.permute.xlu1 %1164 }
 0x150   : > { %v905_v25 = vadd.f32 %v904_v51, %v903_v14  ;;  %v1157_v29 = vadd.f32 %v1156_v16, %v1155_v15  ;;  %v1407_v31 = vadd.f32 %v1406_v24, %v1405_v21  ;;  %v2642_v21 = vld [vmem:[%s3538_s10 + $0x68] sm:$0xff]   ;;  %v2646_v16 = vld [vmem:[%s3538_s10 + $0x58] sm:$0xff]  }
 0x151   : > { %v874_v13 = vmax.f32 %v873_v8, 0.0  ;;  %v1123_v19 = vmul.f32 0.03125, %v1122_v9  ;;  %v1190_v8 = vld [vmem:[%s3535_s7] sm:$0xf]  ;;  %v1191_v9 = vld [vmem:[%s3535_s7 + $0x4] sm:$0xf] }
 0x152   : > { %v906_v32 = vrot.slane %v905_v25, 1  ;;  %v1158_v33 = vrot.slane %v1157_v29, 1  ;;  %v1408_v37 = vrot.slane %v1407_v31, 1  ;;  %v2643_v51 = vld [vmem:[%s3538_s10 + $0x28] sm:$0xff]   ;;  %v2647_v24 = vld [vmem:[%s3538_s10 + $0x18] sm:$0xff]  }
 0x153   : > { %v908_v20 = vadd.f32 1e-05, %v874_v13  ;;  %v1125_v6 = vsub.f32 %v1123_v19, %v1124_v17 }
 0x154   : > { %v907_v38 = vadd.f32 %v906_v32, %v905_v25  ;;  %v1159_v43 = vadd.f32 %v1158_v33, %v1157_v29  ;;  %v1409_v44 = vadd.f32 %v1408_v37, %v1407_v31  ;;  %v2648_v25 = vld [vmem:[%s3538_s10 + $0x50] sm:$0xff]   ;;  %v2650_v31 = vld [vmem:[%s3538_s10 + $0x48] sm:$0xff]   ;;  %v2652_v33 = vld [vmem:[%s3538_s10 + $0x40] sm:$0xff]  }
 0x155   : > { %2663 = vrsqrt.f32 %v908_v20  ;;  %v1126_v23 = vmax.f32 %v1125_v6, 0.0  ;;  %v2649_v29 = vld [vmem:[%s3538_s10 + $0x10] sm:$0xff]   ;;  %v2651_v32 = vld [vmem:[%s3538_s10 + $0x8] sm:$0xff]   ;;  %v2653_v37 = vld [vmem:[%s3538_s10] sm:$0xff]  }
 0x156   : > { %v1419_v36 = vmul.f32 0.03125, %v1409_v44 }
 0x157   : > { %v1160_v10 = vadd.f32 1e-05, %v1126_v23  ;;  %v2644_v23 = vld [vmem:[%s3538_s10 + $0x60] sm:$0xff]  }
 0x158   : > { %v1421_v30 = vadd.f32 1e-05, %v1419_v36 }
 0x159   : > { %2665 = vrsqrt.f32 %v1160_v10  ;;  %v2645_v10 = vld [vmem:[%s3538_s10 + $0x20] sm:$0xff]  }
 0x162   : > { %v2664_v41 = vpop.eup %2663 }
 0x163   : > { %v910_v42 = vmul.f32 %v2664_v41, %v907_v38 }
 0x165   : > { %v915_v45 = vadd.f32 %v3202_v54, %v910_v42  ;;  %v3271_v54 = vshrl.u32 %v1180_v53, 7  ;;  %v1689_v53 = vld [vmem:[%s3537_s9 + $0x8] sm:$0xff] }
 0x166   : > { %v2666_v47 = vpop.eup %2665 }
 0x167   : > { %v1174_v48 = vmul.f32 1.442695, %v915_v45  ;;  %v1162_v49 = vmul.f32 %v2666_v47, %v1159_v43  ;;  %917 = vst.msk [vmem:[%s614_s19] sm:$0x1] %vm916_vm4, %v915_v45  ;;  %v3274_v40 = vsub.s32 0, %v3271_v54 }
 0x169   : > { %2667 = vpow2.f32 %v1174_v48  ;;  %v1167_v50 = vadd.f32 %v1165_v46, %v1162_v49 }
 0x16b   : > { %1169 = vst.msk [vmem:[%s3554_s28] sm:$0x1] %vm1168_vm5, %v1167_v50  ;;  %v1200_v56 = vmul.f32 1.442695, %v1167_v50  ;;  %s2851_s28 = smov [#allocation5]  }
 0x16c   : > { %s2685_s1 = sshll.u32 %s2851_s28, 4  ;;  %s2686_s1 = int_to_ptr.vmem [resolvable:$false] %s2685_s1 }
 0x16d   : > { %2669 = vpow2.f32 %v1200_v56  ;;  %v1436_v56 = vpop.permute.xlu0 %1435  ;;  %s2687_s17 = scalar_lea.vmem %s2686_s1, 32  ;;  %p2688_p1 = scmp.lt.s32.totalorder %s2092_s21, %s2686_s1 }
 0x16e   : > { %2671 = vrsqrt.f32 %v1421_v30  ;;  %p2689_p2 = scmp.lt.s32.totalorder %s2687_s17, %s2681_s29 }
 0x170   : > { %p2690_p3 = por %p2689_p2, %p2688_p1 }
 0x172   : > { %p2691_p5 = pnand %p2690_p3, %p2684_p0 }
 0x176   : > { %v2668_v55 = vpop.eup %2667 }
 0x177   : > { %v1176_v57 = vpack.c.bf16 %v2668_v55, %v2668_v55 }
 0x179   : > { %v1178_v52 = vpack.i.b16 %v1176_v57, %v1176_v57 }
 0x17a   : > { %v2670_v58 = vpop.eup %2669 }
 0x17b   : > { %v1202_v59 = vpack.c.bf16 %v2670_v58, %v2670_v58  ;;  %v1183_v62 = vrot.slane %v1178_v52, %v3274_v40  ;;  %v2672_v1 = vpop.eup %2671 }
 0x17c   : > { %v1431_v11 = vmul.f32 %v2672_v1, %v3217_v12  ;;  %v1429_v13 = vmul.f32 %v2672_v1, %v3211_v0  ;;  %v1427_v20 = vmul.f32 %v2672_v1, %v3209_v61  ;;  %v1425_v15 = vmul.f32 %v2672_v1, %v3207_v60  ;;  %v2377_v0 = vld [vmem:[%s3571_s3 + $0x40] sm:$0xff]  ;;  %v2638_v60 = vld [vmem:[%s3538_s10 + $0x78] sm:$0xff]   ;;  %v2641_v12 = vld [vmem:[%s3538_s10 + $0x30] sm:$0xff]  }
 0x17d   : > { %v1204_v3 = vpack.i.b16 %v1202_v59, %v1202_v59  ;;  %v2366_v4 = vcombine.low %v1183_v62, %v1183_v62  ;;  %v2639_v61 = vld [vmem:[%s3538_s10 + $0x38] sm:$0xff]   ;;  %2453 = vmatprep.subr.bf16.mxu0 %v2638_v60 }
 0x17f   : > { %v1209_v5 = vrot.slane %v1204_v3, %v3274_v40  ;;  %v1188_v39 = vmul.bf16 %v2366_v4, %v1170_v63  ;;  %v1189_v7 = vmul.bf16 %v2366_v4, %v1171_v28  ;;  %v1451_v63 = vpop.permute.xlu0 %1450 }
 0x181   : > { %v2367_v17 = vcombine.low %v1209_v5, %v1209_v5  ;;  %v2374_v18 = vcombine.low %v1188_v39, %v1189_v7  ;;  %v1615_v7 = vpop.permute.xlu1 %1614 }
 0x183   : > { %v1214_v14 = vmul.bf16 %v2367_v17, %v1190_v8  ;;  %v1215_v19 = vmul.bf16 %v2367_v17, %v1191_v9  ;;  %2524 = vmatmul.mubr.msk.bf16.vlgmr.msra.gmra.mxu1 %vm678_vm1, %v2374_v18 }
 0x184   : > { %1491 = vmatpush1.msra.mxu1 %v1431_v11  ;;  %1530 = vmatprep.mubr.f32.mxu1 %v2848_v22 }
 0x185   : > { %v2368_v6 = vcombine.low %v1214_v14, %v1215_v19  ;;  %1492 = vmatprep.subr.mxu1 %v3184_v34  ;;  %v2378_v34 = vld [vmem:[%s3571_s3 + $0x48] sm:$0xff] }
 0x186   : > { %1493 = vmatpush1.msra.mxu1 %v1429_v13 }
 0x187   : > { %2518 = vmatmul.mubr.msk.bf16.vlgmr.msra.gmra.mxu0 %vm932_vm2, %v2368_v6  ;;  %1494 = vmatprep.subr.mxu1 %v3186_v2  ;;  %v2379_v2 = vld [vmem:[%s3571_s3 + $0x50] sm:$0xff] }
 0x188   : > { %1495 = vmatpush1.msra.mxu1 %v1427_v20  ;;  %2454 = vmatpush3.bf16.msra.mxu0 %v2639_v61 }
 0x189   : > { %1496 = vmatprep.subr.mxu1 %v3188_v35  ;;  %v2380_v35 = vld [vmem:[%s3571_s3 + $0x58] sm:$0xff] }
 0x18a   : > { %1497 = vmatpush1.msra.mxu1 %v1425_v15 }
 0x18b   : > { %2385 = vmatmul.mubr.msk.f32.vlgmr.msra.gmra.mxu1 %vm742_vm0, %v2377_v0 }
 0x18c   : > { %1536 = vmatprep.mubr.f32.mxu1 %v2848_v22 }
 0x18f   : > { %2386 = vmatmul.mubr.msk.f32.gmra.mxu1 %vm742_vm0, %v2378_v34  ;;  %v1611_v34 = vpop.permute.xlu0 %1610 }
 0x190   : > { %1542 = vmatprep.mubr.f32.mxu1 %v2848_v22 }
 0x193   : > { %2387 = vmatmul.mubr.msk.f32.gmra.mxu1 %vm742_vm0, %v2379_v2 }
 0x194   : > { %1548 = vmatprep.mubr.f32.mxu1 %v2848_v22  ;;  %v2640_v22 = vld [vmem:[%s3538_s10 + $0x70] sm:$0xff]  }
 0x195   : > { %2455 = vmatprep.subr.bf16.mxu0 %v2640_v22  ;;  %v1619_v22 = vpop.permute.xlu1 %1618 }
 0x196   : > { %2456 = vmatpush3.bf16.msra.mxu0 %v2641_v12 }
 0x197   : > { %2388 = vmatmul.mubr.msk.f32.gmra.mxu1 %vm742_vm0, %v2380_v35  ;;  %2457 = vmatprep.subr.bf16.mxu0 %v2642_v21 }
 0x19a   : > { %2458 = vmatpush3.bf16.msra.mxu0 %v2643_v51 }
 0x19b   : > { %2459 = vmatprep.subr.bf16.mxu0 %v2644_v23 }
 0x19e   : > { %2460 = vmatpush3.bf16.msra.mxu0 %v2645_v10 }
 0x19f   : > { %2461 = vmatprep.subr.bf16.mxu0 %v2646_v16 }
 0x1a2   : > { %2462 = vmatpush3.bf16.msra.mxu0 %v2647_v24  ;;  %v1623_v24 = vpop.permute.xlu0 %1622 }
 0x1a3   : > { %2463 = vmatprep.subr.bf16.mxu0 %v2648_v25 }
 0x1a6   : > { %2464 = vmatpush3.bf16.msra.mxu0 %v2649_v29 }
 0x1a7   : > { %2465 = vmatprep.subr.bf16.mxu0 %v2650_v31 }
 0x1aa   : > { %2466 = vmatpush3.bf16.msra.mxu0 %v2651_v32 }
 0x1ab   : > { %2467 = vmatprep.subr.bf16.mxu0 %v2652_v33 }
 0x1ae   : > { %2468 = vmatpush3.bf16.msra.mxu0 %v2653_v37 }
 0x243   : > { %v1337_v38 = vpop.f32.mrf.mxu1 }
 0x245   : > { %v2525_v41 = vpop.f32.mrf.mxu1 }
 0x247   : > { %v1282_v42 = vpop.f32.mrf.mxu0  ;;  %v1340_v43 = vpop.f32.mrf.mxu1 }
 0x248   : > { %v1338_v44 = vadd.f32 %v1337_v38, %v1282_v42 }
 0x249   : > { %v2519_v45 = vpop.f32.mrf.mxu0  ;;  %v2526_v47 = vpop.f32.mrf.mxu1 }
 0x24a   : > { %1344 = vst.msk [vmem:[#allocation2] sm:$0xff] %vm678_vm1, %v1338_v44 }
 0x24b   : > { %v1285_v46 = vpop.f32.mrf.mxu0  ;;  %v1532_v48 = vpop.f32.mrf.mxu1 }
 0x24c   : > { %v1341_v49 = vadd.f32 %v1340_v43, %v1285_v46  ;;  %v1533_v52 = vadd.f32 %v1532_v48, %v1436_v56 }
 0x24d   : > { %v1534_v36 = vpop.f32.mrf.mxu1  ;;  %v2520_v50 = vpop.f32.mrf.mxu0 }
 0x24e   : > { %1345 = vst.msk [vmem:[#allocation2 + $0x8] sm:$0xff] %vm678_vm1, %v1341_v49  ;;  %v1535_v28 = vadd.f32 %v1534_v36, %v1436_v56  ;;  %v1575_v4 = vmul.f32 %v1533_v52, %v1533_v52  ;;  %v1625_v31 = vmul.f32 %v1611_v34, %v1533_v52 }
 0x24f   : > { %v1538_v30 = vpop.f32.mrf.mxu1 }
 0x250   : > { %v1539_v55 = vadd.f32 %v1538_v30, %v3256_v27  ;;  %v1576_v14 = vmul.f32 %v1535_v28, %v1535_v28  ;;  %v1626_v46 = vmul.f32 %v1611_v34, %v1535_v28 }
 0x251   : > { %v1540_v57 = vpop.f32.mrf.mxu1 }
 0x252   : > { %v1541_v58 = vadd.f32 %v1540_v57, %v3256_v27  ;;  %v1577_v62 = vmul.f32 %v1539_v55, %v1539_v55  ;;  %v1555_v5 = vadd.f32 %v1539_v55, %v1533_v52  ;;  %v1627_v23 = vmul.f32 %v1615_v7, %v1539_v55 }
 0x253   : > { %v1544_v59 = vpop.f32.mrf.mxu1 }
 0x254   : > { %v1545_v1 = vadd.f32 %v1544_v59, %v3258_v26  ;;  %v1578_v8 = vmul.f32 %v1541_v58, %v1541_v58  ;;  %v1583_v17 = vadd.f32 %v1577_v62, %v1575_v4  ;;  %v1564_v27 = vadd.f32 %v1541_v58, %v1535_v28 }
 0x255   : > { %v1546_v3 = vpop.f32.mrf.mxu1  ;;  %v1628_v38 = vmul.f32 %v1615_v7, %v1541_v58  ;;  %v1633_v43 = vadd.f32 %v1627_v23, %v1625_v31 }
 0x256   : > { %v1547_v39 = vadd.f32 %v1546_v3, %v3258_v26  ;;  %v1579_v9 = vmul.f32 %v1545_v1, %v1545_v1  ;;  %v1556_v18 = vadd.f32 %v1555_v5, %v1545_v1  ;;  %v1592_v2 = vadd.f32 %v1578_v8, %v1576_v14 }
 0x257   : > { %v1550_v11 = vpop.f32.mrf.mxu1  ;;  %v1629_v32 = vmul.f32 %v1619_v22, %v1545_v1  ;;  %v1642_v55 = vadd.f32 %v1628_v38, %v1626_v46 }
 0x258   : > { %v1551_v13 = vadd.f32 %v1550_v11, %v1451_v63  ;;  %v1580_v19 = vmul.f32 %v1547_v39, %v1547_v39  ;;  %v1584_v6 = vadd.f32 %v1583_v17, %v1579_v9  ;;  %v1565_v35 = vadd.f32 %v1564_v27, %v1547_v39 }
 0x259   : > { %v1552_v20 = vpop.f32.mrf.mxu1  ;;  %v1630_v48 = vmul.f32 %v1619_v22, %v1547_v39  ;;  %v1634_v50 = vadd.f32 %v1633_v43, %v1629_v32 }
 0x25a   : > { %v1557_v15 = vadd.f32 %v1556_v18, %v1551_v13  ;;  %v1581_v0 = vmul.f32 %v1551_v13, %v1551_v13  ;;  %v1553_v60 = vadd.f32 %v1552_v20, %v1451_v63  ;;  %v1593_v12 = vadd.f32 %v1592_v2, %v1580_v19 }
 0x25b   : > { %v1631_v47 = vmul.f32 %v1623_v24, %v1551_v13  ;;  %v1643_v1 = vadd.f32 %v1642_v55, %v1630_v48 }
 0x25c   : > { %v1558_v61 = vrot.slane %v1557_v15, 4  ;;  %v1585_v26 = vadd.f32 %v1584_v6, %v1581_v0  ;;  %v1566_v21 = vadd.f32 %v1565_v35, %v1553_v60  ;;  %v1582_v51 = vmul.f32 %v1553_v60, %v1553_v60 }
 0x25d   : > { %v1632_v59 = vmul.f32 %v1623_v24, %v1553_v60  ;;  %v1635_v58 = vadd.f32 %v1634_v50, %v1631_v47 }
 0x25e   : > { %v1559_v10 = vadd.f32 %v1558_v61, %v1557_v15  ;;  %v1586_v16 = vrot.slane %v1585_v26, 4  ;;  %v1567_v25 = vrot.slane %v1566_v21, 4  ;;  %v1594_v29 = vadd.f32 %v1593_v12, %v1582_v51 }
 0x25f   : > { %v1644_v39 = vadd.f32 %v1643_v1, %v1632_v59  ;;  %v1636_v17 = vrot.slane %v1635_v58, 4  ;;  %v2850_v51 = vmov 1966171168   ;;  %v2654_v1 = vld [vmem:[%s3539_s11] sm:$0xff]  }
 0x260   : > { %v1560_v33 = vrot.slane %v1559_v10, 2  ;;  %v1587_v37 = vadd.f32 %v1586_v16, %v1585_v26  ;;  %v1568_v41 = vadd.f32 %v1567_v25, %v1566_v21  ;;  %v1595_v42 = vrot.slane %v1594_v29, 4  ;;  %v1659_v25 = vpop.permute.xlu1 %1658  ;;  %2529 = vmatprep.mubr.msk.bf16.mxu1 %vm678_vm1, %v2654_v1 }
 0x261   : > { %v1645_v20 = vrot.slane %v1644_v39, 4  ;;  %v1637_v15 = vadd.f32 %v1636_v17, %v1635_v58  ;;  %v1667_v23 = vunpack.c.l.s4 %v2850_v51 }
 0x262   : > { %v1561_v44 = vadd.f32 %v1560_v33, %v1559_v10  ;;  %v1588_v45 = vrot.slane %v1587_v37, 2  ;;  %v1569_v49 = vrot.slane %v1568_v41, 2  ;;  %v1596_v36 = vadd.f32 %v1595_v42, %v1594_v29 }
 0x263   : > { %v1646_v35 = vadd.f32 %v1645_v20, %v1644_v39  ;;  %v1638_v60 = vrot.slane %v1637_v15, 2  ;;  %v1668_v31 = vunpack.c.0.s8 %v1667_v23  ;;  %v2656_v20 = vld [vmem:[%s3540_s12] sm:$0xff]  }
 0x264   : > { %v1562_v56 = vrot.slane %v1561_v44, 1  ;;  %v1589_v30 = vadd.f32 %v1588_v45, %v1587_v37  ;;  %v1570_v57 = vadd.f32 %v1569_v49, %v1568_v41  ;;  %v1597_v52 = vrot.slane %v1596_v36, 2 }
 0x265   : > { %v1647_v26 = vrot.slane %v1646_v35, 2  ;;  %v1639_v22 = vadd.f32 %v1638_v60, %v1637_v15  ;;  %v1671_v42 = vsub.s32 %v1668_v31, %v3271_v54 }
 0x266   : > { %v1563_v62 = vadd.f32 %v1562_v56, %v1561_v44  ;;  %v1590_v63 = vrot.slane %v1589_v30, 1  ;;  %v1571_v3 = vrot.slane %v1570_v57, 1  ;;  %v1598_v4 = vadd.f32 %v1597_v52, %v1596_v36 }
 0x267   : > { %v1648_v12 = vadd.f32 %v1647_v26, %v1646_v35  ;;  %v1640_v21 = vrot.slane %v1639_v22, 1 }
 0x268   : > { %v1573_v5 = vmul.f32 0.03125, %v1563_v62  ;;  %v1591_v7 = vadd.f32 %v1590_v63, %v1589_v30  ;;  %v1572_v8 = vadd.f32 %v1571_v3, %v1570_v57  ;;  %v1599_v28 = vrot.slane %v1598_v4, 1  ;;  %v1688_v57 = vld [vmem:[%s3537_s9] sm:$0xff] }
 0x269   : > { %v1649_v10 = vrot.slane %v1648_v12, 1  ;;  %v1641_v16 = vadd.f32 %v1640_v21, %v1639_v22 }
 0x26a   : > { %v1601_v9 = vmul.f32 0.03125, %v1591_v7  ;;  %v1603_v11 = vmul.f32 %v1573_v5, %v1573_v5  ;;  %v1574_v18 = vmul.f32 0.03125, %v1572_v8  ;;  %v1600_v13 = vadd.f32 %v1599_v28, %v1598_v4  ;;  %v1686_v5 = vld [vmem:[#allocation2] sm:$0xff] }
 0x26b   : > { %v1650_v32 = vadd.f32 %v1649_v10, %v1648_v12 }
 0x26c   : > { %v1605_v14 = vsub.f32 %v1601_v9, %v1603_v11  ;;  %v1602_v27 = vmul.f32 0.03125, %v1600_v13  ;;  %v1604_v19 = vmul.f32 %v1574_v18, %v1574_v18  ;;  %v1687_v9 = vld [vmem:[#allocation2 + $0x8] sm:$0xff] }
 0x26e   : > { %v1607_v6 = vmax.f32 %v1605_v14, 0.0  ;;  %v1606_v0 = vsub.f32 %v1602_v27, %v1604_v19  ;;  %v2655_v19 = vld [vmem:[%s3539_s11 + $0x8] sm:$0xff]  }
 0x270   : > { %v1651_v34 = vadd.f32 1e-05, %v1607_v6  ;;  %v1608_v2 = vmax.f32 %v1606_v0, 0.0 }
 0x272   : > { %2673 = vrsqrt.f32 %v1651_v34  ;;  %v1652_v61 = vadd.f32 1e-05, %v1608_v2 }
 0x274   : > { %2675 = vrsqrt.f32 %v1652_v61 }
 0x27f   : > { %v2674_v24 = vpop.eup %2673 }
 0x280   : > { %v1655_v29 = vmul.f32 %v2674_v24, %v1641_v16 }
 0x281   : > { %v2676_v33 = vpop.eup %2675 }
 0x282   : > { %v1661_v37 = vadd.f32 %v1659_v25, %v1655_v29  ;;  %v1656_v38 = vmul.f32 %v2676_v33, %v1650_v32 }
 0x284   : > { %v1722_v41 = vmul.f32 1.442695, %v1661_v37  ;;  %v1662_v43 = vadd.f32 %v1659_v25, %v1656_v38 }
 0x286   : > { %2677 = vpow2.f32 %v1722_v41  ;;  %v1665_v44 = vcombine.low %v1661_v37, %v1662_v43  ;;  %v1724_v45 = vmul.f32 1.442695, %v1662_v43 }
 0x288   : > { %v1672_v47 = vrot.slane %v1665_v44, %v1671_v42  ;;  %2679 = vpow2.f32 %v1724_v45 }
 0x28a   : > { %v1679_v46 = vrot.slane %v1672_v47, %v1671_v42 }
 0x28c   : > { %1685 = vst.msk [vmem:[%s3376_s18] sm:$0x3] %vm1683_vm6, %v1679_v46 }
 0x293   : > { %v2678_v48 = vpop.eup %2677 }
 0x294   : > { %v1726_v49 = vpack.c.bf16 %v2678_v48, %v2678_v48 }
 0x295   : > { %v2680_v36 = vpop.eup %2679 }
 0x296   : > { %v1727_v50 = vpack.c.bf16 %v2680_v36, %v2680_v36  ;;  %v1729_v56 = vpack.i.b16 %v1726_v49, %v1726_v49 }
 0x298   : > { %v1736_v54 = vpack.i.b16 %v1727_v50, %v1727_v50  ;;  %v1734_v30 = vrot.slane %v1729_v56, %v3274_v40 }
 0x29a   : > { %v1741_v55 = vrot.slane %v1736_v54, %v3274_v40 }
 0x29c   : > { %v2389_v52 = vcombine.low %v1734_v30, %v1741_v55 }
 0x29e   : > { %v1748_v59 = vmul.bf16 %v2389_v52, %v1688_v57  ;;  %v1749_v62 = vmul.bf16 %v2389_v52, %v1689_v53 }
 0x2a0   : > { %v2391_v63 = vcombine.high %v1748_v59, %v1749_v62  ;;  %v2390_v58 = vcombine.low %v1748_v59, %v1749_v62 }
 0x2a2   : > { %1888 = vmatprep.mubr.bf16.mxu0 %v2391_v63 }
 0x2a3   : > { %1889 = vmatmul.mubr.bf16.vlgmr.msra.gmra.mxu0 %v2390_v58 }
 0x363   : > { %v2469_v40 = vpop.f32.mrf.mxu0 }
 0x365   : > { %v2470_v3 = vpop.f32.mrf.mxu0 }
 0x366   : > { %v2471_v4 = vadd.f32 %v2470_v3, %v2469_v40 }
 0x367   : > { %v2472_v7 = vpop.f32.mrf.mxu0 }
 0x368   : > { %v1897_v8 = vadd.f32 %v2471_v4, %v1686_v5 }
 0x369   : > { %v2473_v28 = vpop.f32.mrf.mxu0 }
 0x36a   : > { %1900 = vst.msk [vmem:[#allocation2] sm:$0xff] %vm678_vm1, %v1897_v8  ;;  %v2474_v39 = vadd.f32 %v2473_v28, %v2472_v7 }
 0x36c   : > { %v1898_v11 = vadd.f32 %v2474_v39, %v1687_v9 }
 0x36e   : > { %1901 = vst.msk [vmem:[#allocation2 + $0x8] sm:$0xff] %vm678_vm1, %v1898_v11 }
 0x371   : > { %v1905_v17 = vld [vmem:[#allocation2] sm:$0xff] }
 0x372   : > { %v1907_v13 = vmul.f32 0.33333334, %v1905_v17 }
 0x375   : > { %v1906_v18 = vld [vmem:[#allocation2 + $0x8] sm:$0xff] }
 0x376   : > { %v1908_v14 = vmul.f32 0.33333334, %v1906_v18 }
 0x378   : > { %v1909_v27 = vpack.c.bf16 %v1908_v14, %v1907_v13 }
 0x37a   : > { %2527 = vmatprep.subr.bf16.mxu1 %v1909_v27 }
 0x37b   : > { %2528 = vmatpush3.bf16.msra.mxu1 %v1909_v27 }
 0x37c   : > { %2533 = vmatprep.subr.bf16.mxu1 %v2656_v20 }
 0x37e   : > { %2530 = vmatmul.mubr.msk.bf16.vlgmr.msra.gmra.mxu1 %vm678_vm1, %v2655_v19 }
 0x37f   : > { %2534 = vmatpush3.bf16.msra.mxu1 %v2656_v20 }
 0x43e   : > { %v2531_v6 = vpop.f32.mrf.mxu1 }
 0x440   : > { %v1964_v15 = vpop.f32.mrf.mxu1 }
 0x442   : > { %v2532_v0 = vpop.f32.mrf.mxu1 }
 0x443   : > { %v1980_v35 = vpack.c.bf16 %v2532_v0, %v2531_v6 }
 0x444   : > { %v1967_v34 = vpop.f32.mrf.mxu1 }
 0x445   : > { %v1979_v2 = vpack.c.bf16 %v1967_v34, %v1964_v15 }
 0x447   : > { %2535 = vmatprep.mubr.msk.bf16.mxu1 %vm678_vm1, %v1979_v2 }
 0x448   : > { %2536 = vmatmul.mubr.msk.bf16.vlgmr.msra.gmra.mxu1 %vm678_vm1, %v1980_v35 }
 0x449   : > { %2694 = shalt.err (!%p2691_p5)
}
 0x44a   : > { %s2695_s20 = scalar_lea.hbm %s2089_s16, 16  ;;  %s2699_s27 = scalar_lea.hbm %s3542_s14, 32 }
 0x44b   : > { %p2696_p6 = scmp.ne.s32.totalorder %s2089_s16, %s2695_s20  ;;  %p2700_p10 = scmp.lt.s32.totalorder %s2089_s16, %s3542_s14 }
 0x44c   : > { %p2701_p11 = scmp.lt.s32.totalorder %s2699_s27, %s2695_s20 }
 0x44d   : > { %p2697_p7 = pnand %p2696_p6, %p2984_p4 }
 0x44e   : > { %p2702_p12 = por %p2701_p11, %p2700_p10 }
 0x44f   : > { %p2698_p9 = pneg %p2697_p7 }
 0x451   : > { %p2703_p13 = pnand %p2702_p12, %p2698_p9 }
 0x453   : > { %2706 = shalt.err (!%p2703_p13)
}
 0x454   : > { %s3577_s1 = scalar_lea.sflag [#allocation6], %s3404_s25  ;;  %s3578_s28 = sshll.u32 %s2835_s24, 4 }
 0x455   : > { %2540 = dma.vmem_to_hbm [thread:$0]  (%p2984_p4), %s2092_s21, 16, %s2089_s16, %s3577_s1  }
 0x456   : > { %s2102_s19 = scalar_lea.hbm %s3543_s15, %s3578_s28  ;;  %s3579_s2 = scalar_lea.vmem [#allocation7], %s3261_s23 }
 0x457   : > { %s2104_s30 = sshll.u32 %s3579_s2, 4  ;;  %s2429_s27 = sshll.u32 %s2835_s24, 5  ;;  %s2105_s30 = int_to_ptr.vmem [resolvable:$true] %s2104_s30 }
 0x458   : > { %s2707_s20 = scalar_lea.vmem %s2105_s30, 16  ;;  %s2852_s13 = smov [#allocation7]  }
 0x459   : > { %p2708_p0 = scmp.ne.s32.totalorder %s2105_s30, %s2707_s20  ;;  %s2711_s3 = sshll.u32 %s2852_s13, 4  ;;  %s2712_s3 = int_to_ptr.vmem [resolvable:$false] %s2711_s3 }
 0x45a   : > { %s2713_s4 = scalar_lea.vmem %s2712_s3, 32  ;;  %p2714_p3 = scmp.lt.s32.totalorder %s2105_s30, %s2712_s3 }
 0x45b   : > { %p2709_p1 = pnand %p2708_p0, %p2984_p4  ;;  %p2715_p5 = scmp.lt.s32.totalorder %s2713_s4, %s2707_s20 }
 0x45d   : > { %p2710_p2 = pneg %p2709_p1  ;;  %p2716_p6 = por %p2715_p5, %p2714_p3 }
 0x45f   : > { %p2717_p7 = pnand %p2716_p6, %p2710_p2 }
 0x461   : > { %2720 = shalt.err (!%p2717_p7)
}
 0x462   : > { %s2721_s16 = scalar_lea.hbm %s2102_s19, 16  ;;  %s2725_s28 = scalar_lea.hbm %s3543_s15, 32 }
 0x463   : > { %p2722_p9 = scmp.ne.s32.totalorder %s2102_s19, %s2721_s16  ;;  %p2726_p12 = scmp.lt.s32.totalorder %s2102_s19, %s3543_s15 }
 0x464   : > { %p2727_p13 = scmp.lt.s32.totalorder %s2725_s28, %s2721_s16 }
 0x465   : > { %p2723_p10 = pnand %p2722_p9, %p2984_p4 }
 0x466   : > { %p2728_p0 = por %p2727_p13, %p2726_p12 }
 0x467   : > { %p2724_p11 = pneg %p2723_p10 }
 0x469   : > { %p2729_p1 = pnand %p2728_p0, %p2724_p11 }
 0x46b   : > { %2732 = shalt.err (!%p2729_p1)
}
 0x46c   : > { %s3580_s3 = scalar_lea.sflag [#allocation6], %s3404_s25  ;;  %s3581_s20 = sld [smem:[#allocation25_spill]] }
 0x46d   : > { %2541 = dma.vmem_to_hbm [thread:$0]  (%p2984_p4), %s2105_s30, 16, %s2102_s19, %s3580_s3  }
 0x46e   : > { %s2120_s21 = sshll.u32 %s3376_s18, 4  ;;  %s2062_s1 = scalar_lea.sflag [#allocation9], %s3261_s23  ;;  %s2121_s21 = int_to_ptr.vmem [resolvable:$true] %s2120_s21 }
 0x46f   : > { %s2733_s29 = scalar_lea.vmem %s2121_s21, 32  ;;  %s2853_s16 = smov [#allocation8]  }
 0x470   : > { %p2734_p2 = scmp.ne.s32.totalorder %s2121_s21, %s2733_s29  ;;  %s2737_s28 = sshll.u32 %s2853_s16, 4  ;;  %s2738_s28 = int_to_ptr.vmem [resolvable:$false] %s2737_s28 }
 0x471   : > { %s2739_s25 = scalar_lea.vmem %s2738_s28, 64  ;;  %p2740_p6 = scmp.lt.s32.totalorder %s2121_s21, %s2738_s28 }
 0x472   : > { %s2118_s13 = scalar_lea.hbm %s3581_s20, %s2429_s27  ;;  %p2735_p3 = pnand %p2734_p2, %p2984_p4 }
 0x473   : > { %p2741_p7 = scmp.lt.s32.totalorder %s2739_s25, %s2733_s29 }
 0x474   : > { %p2736_p5 = pneg %p2735_p3 }
 0x475   : > { %p2742_p9 = por %p2741_p7, %p2740_p6 }
 0x477   : > { %p2743_p10 = pnand %p2742_p9, %p2736_p5 }
 0x479   : > { %2746 = shalt.err (!%p2743_p10)
}
 0x47a   : > { %s2747_s19 = scalar_lea.hbm %s2118_s13, 32  ;;  %s2751_s27 = scalar_lea.hbm %s3581_s20, 64 }
 0x47b   : > { %p2748_p11 = scmp.ne.s32.totalorder %s2118_s13, %s2747_s19  ;;  %p2752_p0 = scmp.lt.s32.totalorder %s2118_s13, %s3581_s20 }
 0x47c   : > { %p2753_p1 = scmp.lt.s32.totalorder %s2751_s27, %s2747_s19 }
 0x47d   : > { %p2749_p12 = pnand %p2748_p11, %p2984_p4 }
 0x47e   : > { %p2754_p2 = por %p2753_p1, %p2752_p0 }
 0x47f   : > { %p2750_p13 = pneg %p2749_p12 }
 0x481   : > { %p2755_p3 = pnand %p2754_p2, %p2750_p13 }
 0x483   : > { %2758 = shalt.err (!%p2755_p3)
}
 0x484   : > { %2542 = dma.vmem_to_hbm [thread:$0]  (%p2984_p4), %s2121_s21, 32, %s2118_s13, %s2062_s1  }
 0x485   : > { %s2342_s4 = sshll.u32 %s3261_s23, 5  ;;  %s2428_s16 = sshll.u32 %s2835_s24, 9 }
 0x486   : > { %s608_s2 = scalar_lea.vmem [#allocation3], %s2342_s4  ;;  %s3582_s1 = sld [smem:[#allocation24_spill]] }
 0x487   : > { %s2075_s29 = sshll.u32 %s608_s2, 4  ;;  %s2049_s25 = scalar_lea.sflag [#allocation4], %s3261_s23  ;;  %s3471_s29 = int_to_ptr.vmem [resolvable:$true] %s2075_s29 }
 0x488   : > { %s2759_s24 = scalar_lea.vmem %s3471_s29, 512  ;;  %s2854_s19 = smov [#allocation3]  }
 0x489   : > { %p2760_p5 = scmp.ne.s32.totalorder %s3471_s29, %s2759_s24  ;;  %s2763_s18 = sshll.u32 %s2854_s19, 4  ;;  %s2764_s18 = int_to_ptr.vmem [resolvable:$false] %s2763_s18 }
 0x48a   : > { %s2765_s30 = scalar_lea.vmem %s2764_s18, 1024  ;;  %p2766_p9 = scmp.lt.s32.totalorder %s3471_s29, %s2764_s18 }
 0x48b   : > { %p2761_p6 = pnand %p2760_p5, %p2984_p4  ;;  %p2767_p10 = scmp.lt.s32.totalorder %s2765_s30, %s2759_s24 }
 0x48c   : > { %s3478_s28 = scalar_lea.hbm %s3582_s1, %s2428_s16 }
 0x48d   : > { %p2762_p7 = pneg %p2761_p6  ;;  %p2768_p11 = por %p2767_p10, %p2766_p9 }
 0x48f   : > { %p2769_p12 = pnand %p2768_p11, %p2762_p7 }
 0x508   : > { %v2537_v60 = vpop.f32.mrf.mxu1 }
 0x509   : > { %2046 = vst.msk [vmem:[%s608_s2 + $0x10] sm:$0xff] %vm742_vm0, %v2537_v60 }
 0x50a   : > { %v2029_v61 = vpop.f32.mrf.mxu1 }
 0x50b   : > { %2044 = vst.msk [vmem:[%s608_s2] sm:$0xff] %vm742_vm0, %v2029_v61 }
 0x50c   : > { %v2538_v26 = vpop.f32.mrf.mxu1 }
 0x50d   : > { %2047 = vst.msk [vmem:[%s608_s2 + $0x18] sm:$0xff] %vm742_vm0, %v2538_v26 }
 0x50e   : > { %v2032_v22 = vpop.f32.mrf.mxu1 }
 0x50f   : > { %2045 = vst.msk [vmem:[%s608_s2 + $0x8] sm:$0xff] %vm742_vm0, %v2032_v22 }
 0x510   : > { %2772 = shalt.err (!%p2769_p12)
}
 0x511   : > { %s2773_s27 = scalar_lea.hbm %s3478_s28, 512  ;;  %s2777_s4 = scalar_lea.hbm %s3582_s1, 1024 }
 0x512   : > { %p2774_p13 = scmp.ne.s32.totalorder %s3478_s28, %s2773_s27  ;;  %p2778_p2 = scmp.lt.s32.totalorder %s3478_s28, %s3582_s1 }
 0x513   : > { %p2779_p3 = scmp.lt.s32.totalorder %s2777_s4, %s2773_s27 }
 0x514   : > { %p2775_p0 = pnand %p2774_p13, %p2984_p4 }
 0x515   : > { %p2780_p5 = por %p2779_p3, %p2778_p2 }
 0x516   : > { %p2776_p1 = pneg %p2775_p0 }
 0x518   : > { %p2781_p6 = pnand %p2780_p5, %p2776_p1 }
 0x51a   : > { %2784 = shalt.err (!%p2781_p6)
}
 0x51b   : > { %s2855_s13 = smov 128   ;;  %s2856_s21 = smov 8  }
 0x51c   : > { %2539 = dma.vmem_to_hbm [thread:$0]  (%p2984_p4), %s3471_s29, 512, %s3478_s28, %s2049_s25, %s2855_s13, %s2855_s13, %s2856_s21  }
 0x51d PF: > { %s3583_s24 = sld [smem:[#allocation13_spill]]  ;;  %p2560_p7 = scmp.ge.s32.totalorder %s2843_s26, 2 }
 0x51f   : > { %p2548_p9 = pnand %p2560_p7, %p2993_p8 }
 0x521   : > { %p2549_p10 = pneg %p2548_p9 }
 0x523   : > { %s2132_s18 = sand.u32 1, %s3583_s24  }
 0x524   : > { %s2133_s30 = scalar_lea.sflag [#allocation4], %s2132_s18 }
 0x525   : > { %2810 = dma.done.wait (%p2549_p10), %s2133_s30, 512  }
 0x526   : > { %2812 = vsyncadd (%p2549_p10), %s2133_s30, 4294966784  ;;  %s3585_s27 = sadd.s32 4294967294, %s2843_s26  }
 0x527   : > { %s2141_s17 = sand.u32 1, %s3585_s27  }
 0x528   : > { %s2142_s3 = scalar_lea.sflag [#allocation6], %s2141_s17 }
 0x529   : > { %2814 = dma.done.wait (%p2549_p10), %s2142_s3, 32  }
 0x52a   : > { %2816 = vsyncadd (%p2549_p10), %s2142_s3, 4294967264  ;;  %s2158_s0 = scalar_lea.sflag [#allocation9], %s2132_s18 }
 0x52b   : > { %2818 = dma.done.wait (%p2549_p10), %s2158_s0, 32  }
 0x52c   : > { %2820 = vsyncadd (%p2549_p10), %s2158_s0, 4294967264  ;;  %s36_s26 = sadd.s32 1, %s2843_s26   ;;  %s3586_s23 = sld [smem:[#allocation14_spill]] }
 0x52d   : > { %p33_p4 = scmp.ge.s32.totalorder %s36_s26, 4   ;;  %s3587_s29 = sld [smem:[#allocation18_spill]] }
 0x52e   : > { %s3588_s24 = sld [smem:[#allocation15_spill]]  ;;  %s3590_s21 = smov %s2827_s22 }
 0x52f   : > { %s3589_s25 = sld [smem:[#allocation16_spill]]  ;;  %35 = sbr.rel (!%p33_p4) target bundleno = 16 (0x10), region = 180 }
 0x532   : > { %s3591_s22 = smov %s3586_s23 }
 0x533   : > { %s3592_s23 = smov %s3587_s29 }
 0x534   :  { %2163 = vsyncpa [#allocation4], 1 }
 0x535   :  { %2165 = vsyncpa [#allocation4 + $0x1], 1 }
 0x536   :  { %2166 = vsyncpa [#allocation6], 1 }
 0x537   :  { %2168 = vsyncpa [#allocation6 + $0x1], 1 }
 0x538   :  { %2169 = vsyncpa [#allocation9], 1 }
 0x539   :  { %2171 = vsyncpa [#allocation9 + $0x1], 1 }

</bundles_post_ra>
